<compile_context>
chip_gen: v7x
topology: tpu7x:2x2x1
jax: 0.10.0
libtpu: 0.0.40
codegen_flags: <defaults>
</compile_context>

<pallas_src>
import jax
import jax.numpy as jnp
from jax.experimental import pallas as pl
from jax.experimental.pallas import tpu as pltpu


def _weight_mean_kernel(w_ref, o_ref):
    """Grid = (D_in//tk, D_out//tn).  w_ref: (E, tk, tn) member weight tiles.

    Sum the E member tiles in f32 on the VPU, fold in 1/E, store bf16.
    """
    e = w_ref.shape[0]
    w_sum = jnp.sum(w_ref[...].astype(jnp.float32), axis=0)
    o_ref[...] = (w_sum * (1.0 / e)).astype(o_ref.dtype)


def _matmul_bias_kernel(x_ref, w_ref, b_ref, o_ref):
    """Grid = (B//tm, D_out//tn, D_in//tk); K is the (trailing) reduction axis.

    Resident f32 output tile is the accumulator.  At k == 0 it is initialised
    with the broadcast pre-averaged bias, so no epilogue pass is needed.
    Both dot operands are bf16 -> fast MXU path; accumulation stays f32.
    """
    k = pl.program_id(2)

    @pl.when(k == 0)
    def _():
        o_ref[...] = jnp.broadcast_to(b_ref[...], o_ref.shape).astype(o_ref.dtype)

    o_ref[...] += jnp.dot(x_ref[...], w_ref[...],
                          preferred_element_type=jnp.float32)


def ensemble_forward(x, w_stack, b_stack, *, tm=512, tn=256, tk=512):
    """Forward of an Ensemble of Linear members (merge_out_fc=None).

    x:       (B, D_in)        activations (f32 or bf16)
    w_stack: (E, D_in, D_out) stacked member weights (already x@W layout)
    b_stack: (E, D_out)       stacked member biases
    returns  (B, D_out) f32 == mean_e(x @ W_e + b_e)
    """
    B, D_in = x.shape
    E, d_in_w, D_out = w_stack.shape
    assert d_in_w == D_in

    # Clamp tiles to the problem (a block equal to the full dim is always legal);
    # otherwise require tile-multiple shapes so every tile is lane/sublane dense.
    tm = min(tm, B)
    tn = min(tn, D_out)
    tk = min(tk, D_in)
    assert B % tm == 0 and D_out % tn == 0 and D_in % tk == 0, (
        "pad B / D_in / D_out to tile multiples (128/256 preferred) for "
        "lane-dense tiles")

    # ---- Pass 1: w_mean = mean_e(W_e), computed once, stored bf16. ----------
    # E is folded into the block shape -> one DMA + one VPU reduction per tile;
    # total HBM weight traffic is a single pass over the stack instead of the
    # old (B/tm) x E re-streaming.
    w_mean = pl.pallas_call(
        _weight_mean_kernel,
        out_shape=jax.ShapeDtypeStruct((D_in, D_out), jnp.bfloat16),
        grid_spec=pltpu.PrefetchScalarGridSpec(
            num_scalar_prefetch=0,
            grid=(D_in // tk, D_out // tn),
            in_specs=[pl.BlockSpec((E, tk, tn), lambda i, j: (0, i, j))],
            out_specs=pl.BlockSpec((tk, tn), lambda i, j: (i, j)),
        ),
        compiler_params=pltpu.CompilerParams(
            dimension_semantics=("parallel", "parallel")),
    )(w_stack)

    # Ensemble-mean bias: tiny (E, D_out) reduction, leave it to XLA.
    b_mean = jnp.mean(b_stack.astype(jnp.float32), axis=0, keepdims=True)  # (1, D_out)

    # bf16 activations: halves the x HBM stream (refetched D_out/tn times) and
    # enables the bf16 MXU path.  Accumulation in the kernel stays f32.
    x_bf16 = x.astype(jnp.bfloat16)

    # ---- Pass 2: out = x @ w_mean + b_mean (tiled bf16 matmul). -------------
    # TODO(synk): if the consumer accepts bf16 output, a bf16 out_shape (with an
    # f32 scratch accumulator) would halve the writeback stream.
    grid = (B // tm, D_out // tn, D_in // tk)
    return pl.pallas_call(
        _matmul_bias_kernel,
        out_shape=jax.ShapeDtypeStruct((B, D_out), jnp.float32),
        grid_spec=pltpu.PrefetchScalarGridSpec(
            num_scalar_prefetch=0,
            grid=grid,
            in_specs=[
                # x tile: constant across j -> fetched once per (i, k).
                pl.BlockSpec((tm, tk), lambda i, j, k: (i, k)),
                # Pre-averaged bf16 weight tile.
                pl.BlockSpec((tk, tn), lambda i, j, k: (k, j)),
                # Pre-averaged bias tile (used only at k == 0).
                pl.BlockSpec((1, tn), lambda i, j, k: (0, j)),
            ],
            # Output tile is resident across the k reduction axis and serves as
            # the f32 accumulator directly.
            out_specs=pl.BlockSpec((tm, tn), lambda i, j, k: (i, j)),
        ),
        compiler_params=pltpu.CompilerParams(
            # Independent output-tile axes shard across v7x's two TensorCores;
            # K reduces into the resident output tile.
            dimension_semantics=("parallel", "parallel", "arbitrary"),
        ),
    )(x_bf16, w_mean, b_mean)


if __name__ == "__main__":
    # Ensemble of 3 Linear(1024 -> 512) members, batch 256.  Shapes are tile
    # multiples so both kernels exercise multi-step grids:
    #   mean kernel grid (2, 2); matmul grid (1, 2, 2).
    E, B, D_in, D_out = 3, 256, 1024, 512

    key = jax.random.PRNGKey(0)
    kx, kw, kb = jax.random.split(key, 3)
    x = jax.random.normal(kx, (B, D_in), dtype=jnp.float32)
    # Member weights stored / streamed in bf16 (halves the dominant HBM stream).
    w_stack = (jax.random.normal(kw, (E, D_in, D_out), dtype=jnp.float32) * 0.1
               ).astype(jnp.bfloat16)
    b_stack = jax.random.normal(kb, (E, D_out), dtype=jnp.float32) * 0.1

    out = ensemble_forward(x, w_stack, b_stack)
    out = jax.block_until_ready(out)

    # Pure-JAX reference of Ensemble.forward (merge_out_fc=None): run every
    # member on the same input, stack the outputs, mean over members (f32 math
    # on the bf16-stored weights).
    w_f32 = w_stack.astype(jnp.float32)
    ref = jnp.mean(
        jnp.stack([x @ w_f32[e] + b_stack[e] for e in range(E)], axis=0), axis=0)

    assert out.shape == (B, D_out)
    # The kernel runs the dot with bf16 operands (x cast to bf16, bf16 mean
    # weight) and f32 accumulation; the algebraic collapse itself is exact.
    # Tolerance is sized for bf16 input rounding (~2^-9 relative) over D_in=1024.
    max_err = float(jnp.max(jnp.abs(out - ref)))
    assert jnp.allclose(out, ref, atol=5e-2, rtol=5e-2), (
        f"mismatch vs reference (max abs err {max_err})")
    print("KERNEL_OK")
</pallas_src>

<mosaic_0001>
module attributes {stable_mosaic.version = 11 : i64} {
  func.func @_weight_mean_kernel(%arg0: i32, %arg1: i32, %arg2: memref<3x512x256xbf16, #tpu.memory_space<vmem>>, %arg3: memref<512x256xbf16, #tpu.memory_space<vmem>>) attributes {dimension_semantics = [#tpu.dimension_semantics<parallel>, #tpu.dimension_semantics<parallel>], iteration_bounds = array<i64: 2, 2>, scalar_prefetch = 0 : i64, scratch_operands = 0 : i64, tpu.core_type = #tpu.core_type<tc>, window_params = [{transform_indices = @transform_0, window_bounds = array<i64: 3, 512, 256>}, {transform_indices = @transform_1, window_bounds = array<i64: 512, 256>}]} {
    %c0 = arith.constant 0 : index
    %c0_0 = arith.constant 0 : index
    %c0_1 = arith.constant 0 : index
    %0 = vector.load %arg2[%c0, %c0_0, %c0_1] : memref<3x512x256xbf16, #tpu.memory_space<vmem>>, vector<3x512x256xbf16>
    %1 = arith.extf %0 : vector<3x512x256xbf16> to vector<3x512x256xf32>
    %cst = arith.constant dense<0.000000e+00> : vector<512x256xf32>
    %2 = vector.multi_reduction <add>, %1, %cst [0] : vector<3x512x256xf32> to vector<512x256xf32>
    %cst_2 = arith.constant 0.333333343 : f32
    %3 = vector.broadcast %cst_2 : f32 to vector<512x256xf32>
    %4 = arith.mulf %2, %3 : vector<512x256xf32>
    %5 = arith.truncf %4 : vector<512x256xf32> to vector<512x256xbf16>
    %c0_3 = arith.constant 0 : index
    %c0_4 = arith.constant 0 : index
    %6 = vector.load %arg3[%c0_3, %c0_4] : memref<512x256xbf16, #tpu.memory_space<vmem>>, vector<512x256xbf16>
    tpu.vector_store %arg3[%c0_3, %c0_4], %5 {strides = array<i32>} : memref<512x256xbf16, #tpu.memory_space<vmem>>, vector<512x256xbf16>,
    return
  }
  func.func @transform_0(%arg0: i32, %arg1: i32) -> (i32, i32, i32) {
    %c0_i32 = arith.constant 0 : i32
    %c0_i32_0 = arith.constant 0 : i32
    return %c0_i32, %arg0, %arg1 : i32, i32, i32
  }
  func.func @transform_1(%arg0: i32, %arg1: i32) -> (i32, i32) {
    %c0_i32 = arith.constant 0 : i32
    return %arg0, %arg1 : i32, i32
  }
}

</mosaic_0001>

<bundles_post_ra>
// kernel: tpu_custom_call.1
= control target key start
LH: loop header
LB: loop body
LE: loop exit
PB: predicated region body
PF: predicated region fallthrough
CT: control target
= control target key end

     0   :  { %6 = vsyncpa [#allocation3], 0  ;;  %s2497_s0 = inlined_call_operand.hbm [shape: bf16[3,1024,512], index: 0, kind: input, shape index: {}]   ;;  %s2498_s1 = inlined_call_operand.hbm [shape: bf16[1024,512], index: 1, kind: output, shape index: {}]  }
   0x1   :  { %8 = vsyncpa [#allocation3 + $0x1], 0 }
   0x2   :  { %9 = vsyncpa [#allocation4], 0 }
   0x3   :  { %11 = vsyncpa [#allocation4 + $0x1], 0  ;;  %s2060_s6 = smov 0   ;;  %s2062_s7 = smov 0  }
   0x4   :  { %s2064_s8 = smov 0   ;;  %s2066_s9 = smov 0  }
   0x5   :  { %s2068_s10 = smov 0   ;;  %s2070_s11 = smov 0  }
   0x6   :  { %s2072_s12 = smov 0   ;;  %s2074_s13 = smov 0  }
   0x7 LB: > { %s1698_s14 = sadd.s32 4294967295, %s2037_s13   ;;  %s1699_s15 = sadd.s32 4294967294, %s2037_s13   ;;  %s2037_s13 = sphi %s2074_s13, %s17_s13   ;;  %s2033_s12 = sphi %s2072_s12, %s2512_s12   ;;  %s2029_s11 = sphi %s2070_s11, %s2511_s11   ;;  %s2025_s10 = sphi %s2068_s10, %s2510_s10   ;;  %s2021_s9 = sphi %s2066_s9, %s2509_s9   ;;  %s2017_s8 = sphi %s2064_s8, %s2508_s8   ;;  %s2013_s7 = sphi %s2062_s7, %s2507_s7   ;;  %s2009_s6 = sphi %s2060_s6, %s2506_s6  }
   0x8   : > { %s26_s16 = sadd.s32 1, %s2029_s11  ;;  %s29_s17 = sadd.s32 1, %s2033_s12 }
   0x9   : > { %p27_p0 = scmp.ge.s32.totalorder %s26_s16, 2  ;;  %p45_p1 = scmp.ne.s32.totalorder %s2017_s8, %s2013_s7 }
   0xa   : > { %p46_p2 = scmp.eq.s32.totalorder %s2037_s13, 0  ;;  %p51_p5 = scmp.ne.s32.totalorder %s2013_s7, %s2009_s6 }
   0xb   : > { %s2514_s16 = smov (%p27_p0, %s26_s16), 0  ;;  %s2516_s17 = smov (!%p27_p0, %s29_s17), %s2033_s12 }
   0xc   : > { %s34_s18 = ssub.s32 %s2029_s11, %s2514_s16  ;;  %p2112_p3 = por %p46_p2, %p45_p1 }
   0xd   : > { %p31_p4 = scmp.ge.s32.totalorder %s2516_s17, 2  ;;  %p52_p6 = scmp.eq.s32.totalorder %s1698_s14, 0 }
   0xe   : > { %p77_p7 = scmp.eq.s32.totalorder %s1698_s14, 3  ;;  %p83_p10 = scmp.eq.s32.totalorder %s1699_s15, 3 }
   0xf   : > { %s2518_s17 = smov (%p31_p4, %s2516_s17), 0  ;;  %p2120_p8 = por %p52_p6, %p51_p5 }
  0x10   : > { %2501 = sst [smem:[#allocation11_spill]] %s2518_s17  ;;  %p2124_p9 = por %p77_p7, %p45_p1 }
  0x11   : > { %s33_s22 = ssub.s32 %s2033_s12, %s2518_s17  ;;  %s38_s24 = sadd.s32 1, %s2017_s8 }
  0x12   : > { %s35_s23 = sor.u32 %s34_s18, %s33_s22  ;;  %p2131_p12 = por %p83_p10, %p51_p5 }
  0x13   : > { %p36_p11 = scmp.eq.s32.totalorder %s35_s23, 0  ;;  %p1701_p13 = scmp.ge.s32.totalorder %s2037_s13, 4 }
  0x15   : > { %s2136_s26 = scalar_select %p36_p11, %s2017_s8, %s38_s24  }
  0x16   : > { %99 = sbr.rel (%p1701_p13) target bundleno = 45 (0x2d), region = 16 }
  0x1d   : > { %s103_s27 = sand.u32 1, %s2017_s8   ;;  %s1703_s28 = sshll.u32 %s2029_s11, 1 }
  0x1e   : > { %s1847_s29 = smul.u32 1536, %s103_s27  ;;  %s1781_s30 = sshll.u32 %s2033_s12, 8 }
  0x1f   : > { %s114_s2 = sadd.s32 %s1781_s30, %s1703_s28  ;;  %s2039_s23 = smov 32768  }
  0x20   : > { %s1705_s3 = sshll.u32 %s114_s2, 6  ;;  %s107_s15 = scalar_lea.vmem [#allocation2], %s1847_s29 }
  0x21   : > { %s116_s14 = scalar_lea.hbm %s2497_s0, %s1705_s3  ;;  %s129_s18 = sshll.u32 %s107_s15, 4  ;;  %s130_s18 = int_to_ptr.vmem [resolvable:$true] %s129_s18 }
  0x22   : > { %s1849_s22 = scalar_select %p2112_p3, [#allocation0], [#allocation8] }
  0x23   : > { %1850 = sst [smem:[#allocation7]] (%p2112_p3), %s2039_s23  ;;  %s2040_s17 = smov 8192  }
  0x24   : > { %s121_s24 = sld [smem:[%s1849_s22]]   ;;  %s2041_s28 = smov 64  }
  0x25   : > { %1851 = sst [smem:[#allocation7 + $0x1]] (%p2112_p3), %s2040_s17  ;;  %s2042_s30 = smov 256  }
  0x26   : > { %1852 = sst [smem:[#allocation7 + $0x2]] (%p2112_p3), %s2041_s28  ;;  %s2043_s29 = smov 128  }
  0x27   : > { %1853 = sst [smem:[#allocation7 + $0x3]] (%p2112_p3), %s2042_s30  ;;  %s2044_s2 = smov 8  }
  0x28   : > { %1854 = sst [smem:[#allocation7 + $0x4]] (%p2112_p3), %s2043_s29  ;;  %s104_s5 = scalar_lea.sflag [#allocation3], %s103_s27 }
  0x29   : > { %1855 = sst [smem:[#allocation7 + $0x5]] (%p2112_p3), %s2044_s2  ;;  %s2045_s15 = smov [#allocation6]  }
  0x2a   : > { %s1706_s3 = sshll.u32 %s121_s24, 26 }
  0x2b   : > { %s1707_s4 = sadd.s32 134217728, %s1706_s3 }
  0x2c   : > { %1856 = dma.general (%p2112_p3), %s116_s14, 24576, %s130_s18, %s104_s5, %s2045_s15, [#allocation7], %s1707_s4, 0  }
  0x2d PF: > { %p1708_p0 = scmp.ge.s32.totalorder %s2037_s13, 1  ;;  %p150_p1 = scmp.lt.s32.totalorder %s2037_s13, 5 }
  0x2f   : > { %p151_p2 = pnand %p1708_p0, %p150_p1 }
  0x30   : > { %s2164_s17 = sand.u32 (!%p151_p2), 1, %s2013_s7  }
  0x31   : > { %154 = sbr.rel (%p151_p2) target bundleno = 288 (0x120), region = 24  ;;  %s157_s23 = scalar_lea.sflag (!%p151_p2), [#allocation3], %s2164_s17 }
  0x32   : > { %s1848_s22 = smul.u32 (!%p151_p2), 1536, %s2164_s17 }
  0x34   : > { %s2168_s24 = scalar_lea.vmem (!%p151_p2), [#allocation2], %s1848_s22 }
  0x38   : > { %2000 = dma.done.wait (%p2120_p8), %s157_s23, 24576  }
  0x39   : > { %2002 = vsyncadd (%p2120_p8), %s157_s23, 4294942720  ;;  %v183_v0 = vld [vmem:[%s2168_s24] sm:$0xff]  ;;  %v184_v7 = vld [vmem:[%s2168_s24 + $0x8] sm:$0xff]  ;;  %s1709_s19 = sshll.u32 %s2164_s17, 9  ;;  %s1776_s27 = sshll.u32 %s2021_s9, 1 }
  0x3a   : > { %v247_v1 = vld [vmem:[%s2168_s24 + $0x200] sm:$0xff]  ;;  %v375_v3 = vunpack.c.l.bf16 %v183_v0  ;;  %v376_v4 = vunpack.c.h.bf16 %v183_v0  ;;  %v248_v8 = vld [vmem:[%s2168_s24 + $0x208] sm:$0xff]  ;;  %v377_v12 = vunpack.c.l.bf16 %v184_v7  ;;  %v378_v13 = vunpack.c.h.bf16 %v184_v7  ;;  %v185_v14 = vld [vmem:[%s2168_s24 + $0x10] sm:$0xff]  ;;  %s2192_s20 = scalar_lea.vmem [#allocation5], %s1709_s19  ;;  %s1846_s14 = sshll.u32 %s2025_s10, 8 }
  0x3b   : > { %v311_v2 = vld [vmem:[%s2168_s24 + $0x400] sm:$0xff]  ;;  %v503_v5 = vunpack.c.l.bf16 %v247_v1  ;;  %v504_v6 = vunpack.c.h.bf16 %v247_v1  ;;  %v312_v9 = vld [vmem:[%s2168_s24 + $0x408] sm:$0xff]  ;;  %v505_v17 = vunpack.c.l.bf16 %v248_v8  ;;  %v506_v18 = vunpack.c.h.bf16 %v248_v8  ;;  %v249_v19 = vld [vmem:[%s2168_s24 + $0x210] sm:$0xff]  ;;  %s1605_s18 = sadd.s32 %s1846_s14, %s1776_s27  ;;  %s1608_s10 = sshll.u32 %s2192_s20, 4  ;;  %s2442_s10 = int_to_ptr.vmem [resolvable:$true] %s1608_s10 }
  0x3c   : > { %v631_v10 = vunpack.c.l.bf16 %v311_v2  ;;  %v632_v11 = vunpack.c.h.bf16 %v311_v2  ;;  %v313_v20 = vld [vmem:[%s2168_s24 + $0x410] sm:$0xff]  ;;  %v633_v21 = vunpack.c.l.bf16 %v312_v9  ;;  %v634_v22 = vunpack.c.h.bf16 %v312_v9  ;;  %v186_v29 = vld [vmem:[%s2168_s24 + $0x18] sm:$0xff]  ;;  %v187_v44 = vld [vmem:[%s2168_s24 + $0x20] sm:$0xff]  ;;  %s1778_s9 = sshll.u32 %s1605_s18, 6  ;;  %s1592_s2 = scalar_lea.sflag [#allocation4], %s2164_s17 }
  0x3d   : > { %v759_v15 = vadd.f32 %v503_v5, %v375_v3  ;;  %v761_v16 = vadd.f32 %v504_v6, %v376_v4  ;;  %v379_v23 = vunpack.c.l.bf16 %v185_v14  ;;  %v380_v24 = vunpack.c.h.bf16 %v185_v14  ;;  %v250_v34 = vld [vmem:[%s2168_s24 + $0x218] sm:$0xff]  ;;  %v251_v53 = vld [vmem:[%s2168_s24 + $0x220] sm:$0xff]  ;;  %v188_v59 = vld [vmem:[%s2168_s24 + $0x28] sm:$0xff]  ;;  %s2440_s29 = scalar_lea.hbm %s2498_s1, %s1778_s9  ;;  %s1939_s3 = scalar_lea.vmem %s2442_s10, 8192 }
  0x3e   : > { %v763_v27 = vadd.f32 %v505_v17, %v377_v12  ;;  %v765_v28 = vadd.f32 %v506_v18, %v378_v13  ;;  %v507_v30 = vunpack.c.l.bf16 %v249_v19  ;;  %v508_v31 = vunpack.c.h.bf16 %v249_v19  ;;  %v314_v39 = vld [vmem:[%s2168_s24 + $0x418] sm:$0xff]  ;;  %v315_v54 = vld [vmem:[%s2168_s24 + $0x420] sm:$0xff]  ;;  %v252_v4 = vld [vmem:[%s2168_s24 + $0x228] sm:$0xff]  ;;  %p1940_p3 = scmp.ne.s32.totalorder %s2442_s10, %s1939_s3  ;;  %s2046_s4 = smov [#allocation5]  }
  0x3f   : > { %v760_v25 = vadd.f32 %v759_v15, %v631_v10  ;;  %v762_v26 = vadd.f32 %v761_v16, %v632_v11  ;;  %v635_v32 = vunpack.c.l.bf16 %v313_v20  ;;  %v636_v33 = vunpack.c.h.bf16 %v313_v20  ;;  %v316_v5 = vld [vmem:[%s2168_s24 + $0x428] sm:$0xff]  ;;  %v189_v10 = vld [vmem:[%s2168_s24 + $0x30] sm:$0xff]  ;;  %s1943_s5 = sshll.u32 %s2046_s4, 4  ;;  %s1944_s5 = int_to_ptr.vmem [resolvable:$false] %s1943_s5 }
  0x40   : > { %v764_v37 = vadd.f32 %v763_v27, %v633_v21  ;;  %v766_v38 = vadd.f32 %v765_v28, %v634_v22  ;;  %v767_v40 = vadd.f32 %v507_v30, %v379_v23  ;;  %v769_v41 = vadd.f32 %v508_v31, %v380_v24  ;;  %v253_v19 = vld [vmem:[%s2168_s24 + $0x230] sm:$0xff]  ;;  %p1941_p4 = pnand %p1940_p3, %p2124_p9  ;;  %s1945_s15 = scalar_lea.vmem %s1944_s5, 16384 }
  0x41   : > { %v1015_v35 = vmul.f32 0.33333334, %v760_v25  ;;  %v1016_v36 = vmul.f32 0.33333334, %v762_v26  ;;  %v381_v42 = vunpack.c.l.bf16 %v186_v29  ;;  %v382_v43 = vunpack.c.h.bf16 %v186_v29  ;;  %v317_v23 = vld [vmem:[%s2168_s24 + $0x430] sm:$0xff]  ;;  %v190_v29 = vld [vmem:[%s2168_s24 + $0x38] sm:$0xff]  ;;  %p1946_p6 = scmp.lt.s32.totalorder %s2442_s10, %s1944_s5  ;;  %p1947_p7 = scmp.lt.s32.totalorder %s1945_s15, %s1939_s3 }
  0x42   : > { %v1017_v46 = vmul.f32 0.33333334, %v764_v37  ;;  %v1018_v47 = vmul.f32 0.33333334, %v766_v38  ;;  %v509_v48 = vunpack.c.l.bf16 %v250_v34  ;;  %v768_v49 = vadd.f32 %v767_v40, %v635_v32  ;;  %p1942_p5 = pneg %p1941_p4 }
  0x43   : > { %v1782_v45 = vpack.c.bf16 %v1016_v36, %v1015_v35  ;;  %v770_v50 = vadd.f32 %v769_v41, %v636_v33  ;;  %v510_v51 = vunpack.c.h.bf16 %v250_v34  ;;  %v637_v52 = vunpack.c.l.bf16 %v314_v39  ;;  %v254_v34 = vld [vmem:[%s2168_s24 + $0x238] sm:$0xff]  ;;  %p1948_p8 = por %p1947_p7, %p1946_p6 }
  0x44   : > { %v1783_v55 = vpack.c.bf16 %v1018_v47, %v1017_v46  ;;  %v638_v56 = vunpack.c.h.bf16 %v314_v39  ;;  %v771_v57 = vadd.f32 %v509_v48, %v381_v42  ;;  %v383_v58 = vunpack.c.l.bf16 %v187_v44  ;;  %v318_v39 = vld [vmem:[%s2168_s24 + $0x438] sm:$0xff] }
  0x45   : > { %1527 = vst [vmem:[%s2192_s20] sm:$0xff] %v1782_v45  ;;  %v1019_v60 = vmul.f32 0.33333334, %v768_v49  ;;  %v1020_v61 = vmul.f32 0.33333334, %v770_v50  ;;  %v773_v62 = vadd.f32 %v510_v51, %v382_v43  ;;  %v384_v63 = vunpack.c.h.bf16 %v187_v44  ;;  %v191_v44 = vld [vmem:[%s2168_s24 + $0x40] sm:$0xff]  ;;  %p1949_p10 = pnand %p1948_p8, %p1942_p5 }
  0x46   : > { %1528 = vst [vmem:[%s2192_s20 + $0x8] sm:$0xff] %v1783_v55  ;;  %v772_v0 = vadd.f32 %v771_v57, %v637_v52  ;;  %v511_v1 = vunpack.c.l.bf16 %v251_v53  ;;  %v512_v2 = vunpack.c.h.bf16 %v251_v53  ;;  %v639_v3 = vunpack.c.l.bf16 %v315_v54  ;;  %v255_v53 = vld [vmem:[%s2168_s24 + $0x240] sm:$0xff] }
  0x47   : > { %v1784_v6 = vpack.c.bf16 %v1020_v61, %v1019_v60  ;;  %v774_v7 = vadd.f32 %v773_v62, %v638_v56  ;;  %v640_v8 = vunpack.c.h.bf16 %v315_v54  ;;  %v385_v9 = vunpack.c.l.bf16 %v188_v59  ;;  %v319_v54 = vld [vmem:[%s2168_s24 + $0x440] sm:$0xff] }
  0x48   : > { %v1021_v11 = vmul.f32 0.33333334, %v772_v0  ;;  %v775_v12 = vadd.f32 %v511_v1, %v383_v58  ;;  %v777_v13 = vadd.f32 %v512_v2, %v384_v63  ;;  %v386_v14 = vunpack.c.h.bf16 %v188_v59  ;;  %v192_v59 = vld [vmem:[%s2168_s24 + $0x48] sm:$0xff] }
  0x49   : > { %1529 = vst [vmem:[%s2192_s20 + $0x10] sm:$0xff] %v1784_v6  ;;  %v1022_v15 = vmul.f32 0.33333334, %v774_v7  ;;  %v513_v16 = vunpack.c.l.bf16 %v252_v4  ;;  %v514_v17 = vunpack.c.h.bf16 %v252_v4  ;;  %v641_v18 = vunpack.c.l.bf16 %v316_v5  ;;  %v256_v4 = vld [vmem:[%s2168_s24 + $0x248] sm:$0xff] }
  0x4a   : > { %v776_v20 = vadd.f32 %v775_v12, %v639_v3  ;;  %v778_v21 = vadd.f32 %v777_v13, %v640_v8  ;;  %v642_v22 = vunpack.c.h.bf16 %v316_v5  ;;  %v387_v24 = vunpack.c.l.bf16 %v189_v10  ;;  %v320_v5 = vld [vmem:[%s2168_s24 + $0x448] sm:$0xff] }
  0x4b   : > { %v1785_v25 = vpack.c.bf16 %v1022_v15, %v1021_v11  ;;  %v779_v26 = vadd.f32 %v513_v16, %v385_v9  ;;  %v781_v27 = vadd.f32 %v514_v17, %v386_v14  ;;  %v388_v28 = vunpack.c.h.bf16 %v189_v10  ;;  %v193_v10 = vld [vmem:[%s2168_s24 + $0x50] sm:$0xff] }
  0x4c   : > { %v1023_v30 = vmul.f32 0.33333334, %v776_v20  ;;  %v1024_v31 = vmul.f32 0.33333334, %v778_v21  ;;  %v515_v32 = vunpack.c.l.bf16 %v253_v19  ;;  %v516_v33 = vunpack.c.h.bf16 %v253_v19  ;;  %v257_v19 = vld [vmem:[%s2168_s24 + $0x250] sm:$0xff] }
  0x4d   : > { %1530 = vst [vmem:[%s2192_s20 + $0x18] sm:$0xff] %v1785_v25  ;;  %v780_v35 = vadd.f32 %v779_v26, %v641_v18  ;;  %v782_v36 = vadd.f32 %v781_v27, %v642_v22  ;;  %v643_v37 = vunpack.c.l.bf16 %v317_v23  ;;  %v644_v38 = vunpack.c.h.bf16 %v317_v23  ;;  %v321_v23 = vld [vmem:[%s2168_s24 + $0x450] sm:$0xff] }
  0x4e   : > { %v1786_v40 = vpack.c.bf16 %v1024_v31, %v1023_v30  ;;  %v783_v41 = vadd.f32 %v515_v32, %v387_v24  ;;  %v785_v42 = vadd.f32 %v516_v33, %v388_v28  ;;  %v389_v43 = vunpack.c.l.bf16 %v190_v29 }
  0x4f   : > { %v1025_v45 = vmul.f32 0.33333334, %v780_v35  ;;  %v1026_v46 = vmul.f32 0.33333334, %v782_v36  ;;  %v390_v47 = vunpack.c.h.bf16 %v190_v29  ;;  %v517_v48 = vunpack.c.l.bf16 %v254_v34  ;;  %v194_v29 = vld [vmem:[%s2168_s24 + $0x58] sm:$0xff] }
  0x50   : > { %1531 = vst [vmem:[%s2192_s20 + $0x20] sm:$0xff] %v1786_v40  ;;  %v784_v49 = vadd.f32 %v783_v41, %v643_v37  ;;  %v786_v50 = vadd.f32 %v785_v42, %v644_v38  ;;  %v518_v51 = vunpack.c.h.bf16 %v254_v34  ;;  %v645_v52 = vunpack.c.l.bf16 %v318_v39  ;;  %v258_v34 = vld [vmem:[%s2168_s24 + $0x258] sm:$0xff] }
  0x51   : > { %v1787_v55 = vpack.c.bf16 %v1026_v46, %v1025_v45  ;;  %v646_v56 = vunpack.c.h.bf16 %v318_v39  ;;  %v787_v57 = vadd.f32 %v517_v48, %v389_v43  ;;  %v391_v58 = vunpack.c.l.bf16 %v191_v44  ;;  %v322_v39 = vld [vmem:[%s2168_s24 + $0x458] sm:$0xff] }
  0x52   : > { %v1027_v60 = vmul.f32 0.33333334, %v784_v49  ;;  %v1028_v61 = vmul.f32 0.33333334, %v786_v50  ;;  %v789_v62 = vadd.f32 %v518_v51, %v390_v47  ;;  %v392_v63 = vunpack.c.h.bf16 %v191_v44  ;;  %v195_v44 = vld [vmem:[%s2168_s24 + $0x60] sm:$0xff] }
  0x53   : > { %1532 = vst [vmem:[%s2192_s20 + $0x28] sm:$0xff] %v1787_v55  ;;  %v788_v0 = vadd.f32 %v787_v57, %v645_v52  ;;  %v519_v1 = vunpack.c.l.bf16 %v255_v53  ;;  %v520_v2 = vunpack.c.h.bf16 %v255_v53  ;;  %v647_v3 = vunpack.c.l.bf16 %v319_v54  ;;  %v259_v53 = vld [vmem:[%s2168_s24 + $0x260] sm:$0xff] }
  0x54   : > { %v1788_v6 = vpack.c.bf16 %v1028_v61, %v1027_v60  ;;  %v790_v7 = vadd.f32 %v789_v62, %v646_v56  ;;  %v648_v8 = vunpack.c.h.bf16 %v319_v54  ;;  %v393_v9 = vunpack.c.l.bf16 %v192_v59  ;;  %v323_v54 = vld [vmem:[%s2168_s24 + $0x460] sm:$0xff] }
  0x55   : > { %v1029_v11 = vmul.f32 0.33333334, %v788_v0  ;;  %v791_v12 = vadd.f32 %v519_v1, %v391_v58  ;;  %v793_v13 = vadd.f32 %v520_v2, %v392_v63  ;;  %v394_v14 = vunpack.c.h.bf16 %v192_v59  ;;  %v196_v59 = vld [vmem:[%s2168_s24 + $0x68] sm:$0xff] }
  0x56   : > { %1533 = vst [vmem:[%s2192_s20 + $0x30] sm:$0xff] %v1788_v6  ;;  %v1030_v15 = vmul.f32 0.33333334, %v790_v7  ;;  %v521_v16 = vunpack.c.l.bf16 %v256_v4  ;;  %v522_v17 = vunpack.c.h.bf16 %v256_v4  ;;  %v649_v18 = vunpack.c.l.bf16 %v320_v5  ;;  %v260_v4 = vld [vmem:[%s2168_s24 + $0x268] sm:$0xff] }
  0x57   : > { %v792_v20 = vadd.f32 %v791_v12, %v647_v3  ;;  %v794_v21 = vadd.f32 %v793_v13, %v648_v8  ;;  %v650_v22 = vunpack.c.h.bf16 %v320_v5  ;;  %v395_v24 = vunpack.c.l.bf16 %v193_v10  ;;  %v324_v5 = vld [vmem:[%s2168_s24 + $0x468] sm:$0xff] }
  0x58   : > { %v1789_v25 = vpack.c.bf16 %v1030_v15, %v1029_v11  ;;  %v795_v26 = vadd.f32 %v521_v16, %v393_v9  ;;  %v797_v27 = vadd.f32 %v522_v17, %v394_v14  ;;  %v396_v28 = vunpack.c.h.bf16 %v193_v10  ;;  %v197_v10 = vld [vmem:[%s2168_s24 + $0x70] sm:$0xff] }
  0x59   : > { %v1031_v30 = vmul.f32 0.33333334, %v792_v20  ;;  %v1032_v31 = vmul.f32 0.33333334, %v794_v21  ;;  %v523_v32 = vunpack.c.l.bf16 %v257_v19  ;;  %v524_v33 = vunpack.c.h.bf16 %v257_v19  ;;  %v261_v19 = vld [vmem:[%s2168_s24 + $0x270] sm:$0xff] }
  0x5a   : > { %1534 = vst [vmem:[%s2192_s20 + $0x38] sm:$0xff] %v1789_v25  ;;  %v796_v35 = vadd.f32 %v795_v26, %v649_v18  ;;  %v798_v36 = vadd.f32 %v797_v27, %v650_v22  ;;  %v651_v37 = vunpack.c.l.bf16 %v321_v23  ;;  %v652_v38 = vunpack.c.h.bf16 %v321_v23  ;;  %v325_v23 = vld [vmem:[%s2168_s24 + $0x470] sm:$0xff] }
  0x5b   : > { %v1790_v40 = vpack.c.bf16 %v1032_v31, %v1031_v30  ;;  %v799_v41 = vadd.f32 %v523_v32, %v395_v24  ;;  %v801_v42 = vadd.f32 %v524_v33, %v396_v28  ;;  %v397_v43 = vunpack.c.l.bf16 %v194_v29 }
  0x5c   : > { %v1033_v45 = vmul.f32 0.33333334, %v796_v35  ;;  %v1034_v46 = vmul.f32 0.33333334, %v798_v36  ;;  %v398_v47 = vunpack.c.h.bf16 %v194_v29  ;;  %v525_v48 = vunpack.c.l.bf16 %v258_v34  ;;  %v198_v29 = vld [vmem:[%s2168_s24 + $0x78] sm:$0xff] }
  0x5d   : > { %1535 = vst [vmem:[%s2192_s20 + $0x40] sm:$0xff] %v1790_v40  ;;  %v800_v49 = vadd.f32 %v799_v41, %v651_v37  ;;  %v802_v50 = vadd.f32 %v801_v42, %v652_v38  ;;  %v526_v51 = vunpack.c.h.bf16 %v258_v34  ;;  %v653_v52 = vunpack.c.l.bf16 %v322_v39  ;;  %v262_v34 = vld [vmem:[%s2168_s24 + $0x278] sm:$0xff] }
  0x5e   : > { %v1791_v55 = vpack.c.bf16 %v1034_v46, %v1033_v45  ;;  %v654_v56 = vunpack.c.h.bf16 %v322_v39  ;;  %v803_v57 = vadd.f32 %v525_v48, %v397_v43  ;;  %v399_v58 = vunpack.c.l.bf16 %v195_v44  ;;  %v326_v39 = vld [vmem:[%s2168_s24 + $0x478] sm:$0xff] }
  0x5f   : > { %v1035_v60 = vmul.f32 0.33333334, %v800_v49  ;;  %v1036_v61 = vmul.f32 0.33333334, %v802_v50  ;;  %v805_v62 = vadd.f32 %v526_v51, %v398_v47  ;;  %v400_v63 = vunpack.c.h.bf16 %v195_v44  ;;  %v199_v44 = vld [vmem:[%s2168_s24 + $0x80] sm:$0xff] }
  0x60   : > { %1536 = vst [vmem:[%s2192_s20 + $0x48] sm:$0xff] %v1791_v55  ;;  %v804_v0 = vadd.f32 %v803_v57, %v653_v52  ;;  %v527_v1 = vunpack.c.l.bf16 %v259_v53  ;;  %v528_v2 = vunpack.c.h.bf16 %v259_v53  ;;  %v655_v3 = vunpack.c.l.bf16 %v323_v54  ;;  %v263_v53 = vld [vmem:[%s2168_s24 + $0x280] sm:$0xff] }
  0x61   : > { %v1792_v6 = vpack.c.bf16 %v1036_v61, %v1035_v60  ;;  %v806_v7 = vadd.f32 %v805_v62, %v654_v56  ;;  %v656_v8 = vunpack.c.h.bf16 %v323_v54  ;;  %v401_v9 = vunpack.c.l.bf16 %v196_v59  ;;  %v327_v54 = vld [vmem:[%s2168_s24 + $0x480] sm:$0xff] }
  0x62   : > { %v1037_v11 = vmul.f32 0.33333334, %v804_v0  ;;  %v807_v12 = vadd.f32 %v527_v1, %v399_v58  ;;  %v809_v13 = vadd.f32 %v528_v2, %v400_v63  ;;  %v402_v14 = vunpack.c.h.bf16 %v196_v59  ;;  %v200_v59 = vld [vmem:[%s2168_s24 + $0x88] sm:$0xff] }
  0x63   : > { %1537 = vst [vmem:[%s2192_s20 + $0x50] sm:$0xff] %v1792_v6  ;;  %v1038_v15 = vmul.f32 0.33333334, %v806_v7  ;;  %v529_v16 = vunpack.c.l.bf16 %v260_v4  ;;  %v530_v17 = vunpack.c.h.bf16 %v260_v4  ;;  %v657_v18 = vunpack.c.l.bf16 %v324_v5  ;;  %v264_v4 = vld [vmem:[%s2168_s24 + $0x288] sm:$0xff] }
  0x64   : > { %v808_v20 = vadd.f32 %v807_v12, %v655_v3  ;;  %v810_v21 = vadd.f32 %v809_v13, %v656_v8  ;;  %v658_v22 = vunpack.c.h.bf16 %v324_v5  ;;  %v403_v24 = vunpack.c.l.bf16 %v197_v10  ;;  %v328_v5 = vld [vmem:[%s2168_s24 + $0x488] sm:$0xff] }
  0x65   : > { %v1793_v25 = vpack.c.bf16 %v1038_v15, %v1037_v11  ;;  %v811_v26 = vadd.f32 %v529_v16, %v401_v9  ;;  %v813_v27 = vadd.f32 %v530_v17, %v402_v14  ;;  %v404_v28 = vunpack.c.h.bf16 %v197_v10  ;;  %v201_v10 = vld [vmem:[%s2168_s24 + $0x90] sm:$0xff] }
  0x66   : > { %v1039_v30 = vmul.f32 0.33333334, %v808_v20  ;;  %v1040_v31 = vmul.f32 0.33333334, %v810_v21  ;;  %v531_v32 = vunpack.c.l.bf16 %v261_v19  ;;  %v532_v33 = vunpack.c.h.bf16 %v261_v19  ;;  %v265_v19 = vld [vmem:[%s2168_s24 + $0x290] sm:$0xff] }
  0x67   : > { %1538 = vst [vmem:[%s2192_s20 + $0x58] sm:$0xff] %v1793_v25  ;;  %v812_v35 = vadd.f32 %v811_v26, %v657_v18  ;;  %v814_v36 = vadd.f32 %v813_v27, %v658_v22  ;;  %v659_v37 = vunpack.c.l.bf16 %v325_v23  ;;  %v660_v38 = vunpack.c.h.bf16 %v325_v23  ;;  %v329_v23 = vld [vmem:[%s2168_s24 + $0x490] sm:$0xff] }
  0x68   : > { %v1794_v40 = vpack.c.bf16 %v1040_v31, %v1039_v30  ;;  %v815_v41 = vadd.f32 %v531_v32, %v403_v24  ;;  %v817_v42 = vadd.f32 %v532_v33, %v404_v28  ;;  %v405_v43 = vunpack.c.l.bf16 %v198_v29 }
  0x69   : > { %v1041_v45 = vmul.f32 0.33333334, %v812_v35  ;;  %v1042_v46 = vmul.f32 0.33333334, %v814_v36  ;;  %v406_v47 = vunpack.c.h.bf16 %v198_v29  ;;  %v533_v48 = vunpack.c.l.bf16 %v262_v34  ;;  %v202_v29 = vld [vmem:[%s2168_s24 + $0x98] sm:$0xff] }
  0x6a   : > { %1539 = vst [vmem:[%s2192_s20 + $0x60] sm:$0xff] %v1794_v40  ;;  %v816_v49 = vadd.f32 %v815_v41, %v659_v37  ;;  %v818_v50 = vadd.f32 %v817_v42, %v660_v38  ;;  %v534_v51 = vunpack.c.h.bf16 %v262_v34  ;;  %v661_v52 = vunpack.c.l.bf16 %v326_v39  ;;  %v266_v34 = vld [vmem:[%s2168_s24 + $0x298] sm:$0xff] }
  0x6b   : > { %v1795_v55 = vpack.c.bf16 %v1042_v46, %v1041_v45  ;;  %v662_v56 = vunpack.c.h.bf16 %v326_v39  ;;  %v819_v57 = vadd.f32 %v533_v48, %v405_v43  ;;  %v407_v58 = vunpack.c.l.bf16 %v199_v44  ;;  %v330_v39 = vld [vmem:[%s2168_s24 + $0x498] sm:$0xff] }
  0x6c   : > { %v1043_v60 = vmul.f32 0.33333334, %v816_v49  ;;  %v1044_v61 = vmul.f32 0.33333334, %v818_v50  ;;  %v821_v62 = vadd.f32 %v534_v51, %v406_v47  ;;  %v408_v63 = vunpack.c.h.bf16 %v199_v44  ;;  %v203_v44 = vld [vmem:[%s2168_s24 + $0xa0] sm:$0xff] }
  0x6d   : > { %1540 = vst [vmem:[%s2192_s20 + $0x68] sm:$0xff] %v1795_v55  ;;  %v820_v0 = vadd.f32 %v819_v57, %v661_v52  ;;  %v535_v1 = vunpack.c.l.bf16 %v263_v53  ;;  %v536_v2 = vunpack.c.h.bf16 %v263_v53  ;;  %v663_v3 = vunpack.c.l.bf16 %v327_v54  ;;  %v267_v53 = vld [vmem:[%s2168_s24 + $0x2a0] sm:$0xff] }
  0x6e   : > { %v1796_v6 = vpack.c.bf16 %v1044_v61, %v1043_v60  ;;  %v822_v7 = vadd.f32 %v821_v62, %v662_v56  ;;  %v664_v8 = vunpack.c.h.bf16 %v327_v54  ;;  %v409_v9 = vunpack.c.l.bf16 %v200_v59  ;;  %v331_v54 = vld [vmem:[%s2168_s24 + $0x4a0] sm:$0xff] }
  0x6f   : > { %v1045_v11 = vmul.f32 0.33333334, %v820_v0  ;;  %v823_v12 = vadd.f32 %v535_v1, %v407_v58  ;;  %v825_v13 = vadd.f32 %v536_v2, %v408_v63  ;;  %v410_v14 = vunpack.c.h.bf16 %v200_v59  ;;  %v204_v59 = vld [vmem:[%s2168_s24 + $0xa8] sm:$0xff] }
  0x70   : > { %1541 = vst [vmem:[%s2192_s20 + $0x70] sm:$0xff] %v1796_v6  ;;  %v1046_v15 = vmul.f32 0.33333334, %v822_v7  ;;  %v537_v16 = vunpack.c.l.bf16 %v264_v4  ;;  %v538_v17 = vunpack.c.h.bf16 %v264_v4  ;;  %v665_v18 = vunpack.c.l.bf16 %v328_v5  ;;  %v268_v4 = vld [vmem:[%s2168_s24 + $0x2a8] sm:$0xff] }
  0x71   : > { %v824_v20 = vadd.f32 %v823_v12, %v663_v3  ;;  %v826_v21 = vadd.f32 %v825_v13, %v664_v8  ;;  %v666_v22 = vunpack.c.h.bf16 %v328_v5  ;;  %v411_v24 = vunpack.c.l.bf16 %v201_v10  ;;  %v332_v5 = vld [vmem:[%s2168_s24 + $0x4a8] sm:$0xff] }
  0x72   : > { %v1797_v25 = vpack.c.bf16 %v1046_v15, %v1045_v11  ;;  %v827_v26 = vadd.f32 %v537_v16, %v409_v9  ;;  %v829_v27 = vadd.f32 %v538_v17, %v410_v14  ;;  %v412_v28 = vunpack.c.h.bf16 %v201_v10  ;;  %v205_v10 = vld [vmem:[%s2168_s24 + $0xb0] sm:$0xff] }
  0x73   : > { %v1047_v30 = vmul.f32 0.33333334, %v824_v20  ;;  %v1048_v31 = vmul.f32 0.33333334, %v826_v21  ;;  %v539_v32 = vunpack.c.l.bf16 %v265_v19  ;;  %v540_v33 = vunpack.c.h.bf16 %v265_v19  ;;  %v269_v19 = vld [vmem:[%s2168_s24 + $0x2b0] sm:$0xff] }
  0x74   : > { %1542 = vst [vmem:[%s2192_s20 + $0x78] sm:$0xff] %v1797_v25  ;;  %v828_v35 = vadd.f32 %v827_v26, %v665_v18  ;;  %v830_v36 = vadd.f32 %v829_v27, %v666_v22  ;;  %v667_v37 = vunpack.c.l.bf16 %v329_v23  ;;  %v668_v38 = vunpack.c.h.bf16 %v329_v23  ;;  %v333_v23 = vld [vmem:[%s2168_s24 + $0x4b0] sm:$0xff] }
  0x75   : > { %v1798_v40 = vpack.c.bf16 %v1048_v31, %v1047_v30  ;;  %v831_v41 = vadd.f32 %v539_v32, %v411_v24  ;;  %v833_v42 = vadd.f32 %v540_v33, %v412_v28  ;;  %v413_v43 = vunpack.c.l.bf16 %v202_v29 }
  0x76   : > { %v1049_v45 = vmul.f32 0.33333334, %v828_v35  ;;  %v1050_v46 = vmul.f32 0.33333334, %v830_v36  ;;  %v414_v47 = vunpack.c.h.bf16 %v202_v29  ;;  %v541_v48 = vunpack.c.l.bf16 %v266_v34  ;;  %v206_v29 = vld [vmem:[%s2168_s24 + $0xb8] sm:$0xff] }
  0x77   : > { %1543 = vst [vmem:[%s2192_s20 + $0x80] sm:$0xff] %v1798_v40  ;;  %v832_v49 = vadd.f32 %v831_v41, %v667_v37  ;;  %v834_v50 = vadd.f32 %v833_v42, %v668_v38  ;;  %v542_v51 = vunpack.c.h.bf16 %v266_v34  ;;  %v669_v52 = vunpack.c.l.bf16 %v330_v39  ;;  %v270_v34 = vld [vmem:[%s2168_s24 + $0x2b8] sm:$0xff] }
  0x78   : > { %v1799_v55 = vpack.c.bf16 %v1050_v46, %v1049_v45  ;;  %v670_v56 = vunpack.c.h.bf16 %v330_v39  ;;  %v835_v57 = vadd.f32 %v541_v48, %v413_v43  ;;  %v415_v58 = vunpack.c.l.bf16 %v203_v44  ;;  %v334_v39 = vld [vmem:[%s2168_s24 + $0x4b8] sm:$0xff] }
  0x79   : > { %v1051_v60 = vmul.f32 0.33333334, %v832_v49  ;;  %v1052_v61 = vmul.f32 0.33333334, %v834_v50  ;;  %v837_v62 = vadd.f32 %v542_v51, %v414_v47  ;;  %v416_v63 = vunpack.c.h.bf16 %v203_v44  ;;  %v207_v44 = vld [vmem:[%s2168_s24 + $0xc0] sm:$0xff] }
  0x7a   : > { %1544 = vst [vmem:[%s2192_s20 + $0x88] sm:$0xff] %v1799_v55  ;;  %v836_v0 = vadd.f32 %v835_v57, %v669_v52  ;;  %v543_v1 = vunpack.c.l.bf16 %v267_v53  ;;  %v544_v2 = vunpack.c.h.bf16 %v267_v53  ;;  %v671_v3 = vunpack.c.l.bf16 %v331_v54  ;;  %v271_v53 = vld [vmem:[%s2168_s24 + $0x2c0] sm:$0xff] }
  0x7b   : > { %v1800_v6 = vpack.c.bf16 %v1052_v61, %v1051_v60  ;;  %v838_v7 = vadd.f32 %v837_v62, %v670_v56  ;;  %v672_v8 = vunpack.c.h.bf16 %v331_v54  ;;  %v417_v9 = vunpack.c.l.bf16 %v204_v59  ;;  %v335_v54 = vld [vmem:[%s2168_s24 + $0x4c0] sm:$0xff] }
  0x7c   : > { %v1053_v11 = vmul.f32 0.33333334, %v836_v0  ;;  %v839_v12 = vadd.f32 %v543_v1, %v415_v58  ;;  %v841_v13 = vadd.f32 %v544_v2, %v416_v63  ;;  %v418_v14 = vunpack.c.h.bf16 %v204_v59  ;;  %v208_v59 = vld [vmem:[%s2168_s24 + $0xc8] sm:$0xff] }
  0x7d   : > { %1545 = vst [vmem:[%s2192_s20 + $0x90] sm:$0xff] %v1800_v6  ;;  %v1054_v15 = vmul.f32 0.33333334, %v838_v7  ;;  %v545_v16 = vunpack.c.l.bf16 %v268_v4  ;;  %v546_v17 = vunpack.c.h.bf16 %v268_v4  ;;  %v673_v18 = vunpack.c.l.bf16 %v332_v5  ;;  %v272_v4 = vld [vmem:[%s2168_s24 + $0x2c8] sm:$0xff] }
  0x7e   : > { %v840_v20 = vadd.f32 %v839_v12, %v671_v3  ;;  %v842_v21 = vadd.f32 %v841_v13, %v672_v8  ;;  %v674_v22 = vunpack.c.h.bf16 %v332_v5  ;;  %v419_v24 = vunpack.c.l.bf16 %v205_v10  ;;  %v336_v5 = vld [vmem:[%s2168_s24 + $0x4c8] sm:$0xff] }
  0x7f   : > { %v1801_v25 = vpack.c.bf16 %v1054_v15, %v1053_v11  ;;  %v843_v26 = vadd.f32 %v545_v16, %v417_v9  ;;  %v845_v27 = vadd.f32 %v546_v17, %v418_v14  ;;  %v420_v28 = vunpack.c.h.bf16 %v205_v10  ;;  %v209_v10 = vld [vmem:[%s2168_s24 + $0xd0] sm:$0xff] }
  0x80   : > { %v1055_v30 = vmul.f32 0.33333334, %v840_v20  ;;  %v1056_v31 = vmul.f32 0.33333334, %v842_v21  ;;  %v547_v32 = vunpack.c.l.bf16 %v269_v19  ;;  %v548_v33 = vunpack.c.h.bf16 %v269_v19  ;;  %v273_v19 = vld [vmem:[%s2168_s24 + $0x2d0] sm:$0xff] }
  0x81   : > { %1546 = vst [vmem:[%s2192_s20 + $0x98] sm:$0xff] %v1801_v25  ;;  %v844_v35 = vadd.f32 %v843_v26, %v673_v18  ;;  %v846_v36 = vadd.f32 %v845_v27, %v674_v22  ;;  %v675_v37 = vunpack.c.l.bf16 %v333_v23  ;;  %v676_v38 = vunpack.c.h.bf16 %v333_v23  ;;  %v337_v23 = vld [vmem:[%s2168_s24 + $0x4d0] sm:$0xff] }
  0x82   : > { %v1802_v40 = vpack.c.bf16 %v1056_v31, %v1055_v30  ;;  %v847_v41 = vadd.f32 %v547_v32, %v419_v24  ;;  %v849_v42 = vadd.f32 %v548_v33, %v420_v28  ;;  %v421_v43 = vunpack.c.l.bf16 %v206_v29 }
  0x83   : > { %v1057_v45 = vmul.f32 0.33333334, %v844_v35  ;;  %v1058_v46 = vmul.f32 0.33333334, %v846_v36  ;;  %v422_v47 = vunpack.c.h.bf16 %v206_v29  ;;  %v549_v48 = vunpack.c.l.bf16 %v270_v34  ;;  %v210_v29 = vld [vmem:[%s2168_s24 + $0xd8] sm:$0xff] }
  0x84   : > { %1547 = vst [vmem:[%s2192_s20 + $0xa0] sm:$0xff] %v1802_v40  ;;  %v848_v49 = vadd.f32 %v847_v41, %v675_v37  ;;  %v850_v50 = vadd.f32 %v849_v42, %v676_v38  ;;  %v550_v51 = vunpack.c.h.bf16 %v270_v34  ;;  %v677_v52 = vunpack.c.l.bf16 %v334_v39  ;;  %v274_v34 = vld [vmem:[%s2168_s24 + $0x2d8] sm:$0xff] }
  0x85   : > { %v1803_v55 = vpack.c.bf16 %v1058_v46, %v1057_v45  ;;  %v678_v56 = vunpack.c.h.bf16 %v334_v39  ;;  %v851_v57 = vadd.f32 %v549_v48, %v421_v43  ;;  %v423_v58 = vunpack.c.l.bf16 %v207_v44  ;;  %v338_v39 = vld [vmem:[%s2168_s24 + $0x4d8] sm:$0xff] }
  0x86   : > { %v1059_v60 = vmul.f32 0.33333334, %v848_v49  ;;  %v1060_v61 = vmul.f32 0.33333334, %v850_v50  ;;  %v853_v62 = vadd.f32 %v550_v51, %v422_v47  ;;  %v424_v63 = vunpack.c.h.bf16 %v207_v44  ;;  %v211_v44 = vld [vmem:[%s2168_s24 + $0xe0] sm:$0xff] }
  0x87   : > { %1548 = vst [vmem:[%s2192_s20 + $0xa8] sm:$0xff] %v1803_v55  ;;  %v852_v0 = vadd.f32 %v851_v57, %v677_v52  ;;  %v551_v1 = vunpack.c.l.bf16 %v271_v53  ;;  %v552_v2 = vunpack.c.h.bf16 %v271_v53  ;;  %v679_v3 = vunpack.c.l.bf16 %v335_v54  ;;  %v275_v53 = vld [vmem:[%s2168_s24 + $0x2e0] sm:$0xff] }
  0x88   : > { %v1804_v6 = vpack.c.bf16 %v1060_v61, %v1059_v60  ;;  %v854_v7 = vadd.f32 %v853_v62, %v678_v56  ;;  %v680_v8 = vunpack.c.h.bf16 %v335_v54  ;;  %v425_v9 = vunpack.c.l.bf16 %v208_v59  ;;  %v339_v54 = vld [vmem:[%s2168_s24 + $0x4e0] sm:$0xff] }
  0x89   : > { %v1061_v11 = vmul.f32 0.33333334, %v852_v0  ;;  %v855_v12 = vadd.f32 %v551_v1, %v423_v58  ;;  %v857_v13 = vadd.f32 %v552_v2, %v424_v63  ;;  %v426_v14 = vunpack.c.h.bf16 %v208_v59  ;;  %v212_v59 = vld [vmem:[%s2168_s24 + $0xe8] sm:$0xff] }
  0x8a   : > { %1549 = vst [vmem:[%s2192_s20 + $0xb0] sm:$0xff] %v1804_v6  ;;  %v1062_v15 = vmul.f32 0.33333334, %v854_v7  ;;  %v553_v16 = vunpack.c.l.bf16 %v272_v4  ;;  %v554_v17 = vunpack.c.h.bf16 %v272_v4  ;;  %v681_v18 = vunpack.c.l.bf16 %v336_v5  ;;  %v276_v4 = vld [vmem:[%s2168_s24 + $0x2e8] sm:$0xff] }
  0x8b   : > { %v856_v20 = vadd.f32 %v855_v12, %v679_v3  ;;  %v858_v21 = vadd.f32 %v857_v13, %v680_v8  ;;  %v682_v22 = vunpack.c.h.bf16 %v336_v5  ;;  %v427_v24 = vunpack.c.l.bf16 %v209_v10  ;;  %v340_v5 = vld [vmem:[%s2168_s24 + $0x4e8] sm:$0xff] }
  0x8c   : > { %v1805_v25 = vpack.c.bf16 %v1062_v15, %v1061_v11  ;;  %v859_v26 = vadd.f32 %v553_v16, %v425_v9  ;;  %v861_v27 = vadd.f32 %v554_v17, %v426_v14  ;;  %v428_v28 = vunpack.c.h.bf16 %v209_v10  ;;  %v213_v10 = vld [vmem:[%s2168_s24 + $0xf0] sm:$0xff] }
  0x8d   : > { %v1063_v30 = vmul.f32 0.33333334, %v856_v20  ;;  %v1064_v31 = vmul.f32 0.33333334, %v858_v21  ;;  %v555_v32 = vunpack.c.l.bf16 %v273_v19  ;;  %v556_v33 = vunpack.c.h.bf16 %v273_v19  ;;  %v277_v19 = vld [vmem:[%s2168_s24 + $0x2f0] sm:$0xff] }
  0x8e   : > { %1550 = vst [vmem:[%s2192_s20 + $0xb8] sm:$0xff] %v1805_v25  ;;  %v860_v35 = vadd.f32 %v859_v26, %v681_v18  ;;  %v862_v36 = vadd.f32 %v861_v27, %v682_v22  ;;  %v683_v37 = vunpack.c.l.bf16 %v337_v23  ;;  %v684_v38 = vunpack.c.h.bf16 %v337_v23  ;;  %v341_v23 = vld [vmem:[%s2168_s24 + $0x4f0] sm:$0xff] }
  0x8f   : > { %v1806_v40 = vpack.c.bf16 %v1064_v31, %v1063_v30  ;;  %v863_v41 = vadd.f32 %v555_v32, %v427_v24  ;;  %v865_v42 = vadd.f32 %v556_v33, %v428_v28  ;;  %v429_v43 = vunpack.c.l.bf16 %v210_v29 }
  0x90   : > { %v1065_v45 = vmul.f32 0.33333334, %v860_v35  ;;  %v1066_v46 = vmul.f32 0.33333334, %v862_v36  ;;  %v430_v47 = vunpack.c.h.bf16 %v210_v29  ;;  %v557_v48 = vunpack.c.l.bf16 %v274_v34  ;;  %v214_v29 = vld [vmem:[%s2168_s24 + $0xf8] sm:$0xff] }
  0x91   : > { %1551 = vst [vmem:[%s2192_s20 + $0xc0] sm:$0xff] %v1806_v40  ;;  %v864_v49 = vadd.f32 %v863_v41, %v683_v37  ;;  %v866_v50 = vadd.f32 %v865_v42, %v684_v38  ;;  %v558_v51 = vunpack.c.h.bf16 %v274_v34  ;;  %v685_v52 = vunpack.c.l.bf16 %v338_v39  ;;  %v278_v34 = vld [vmem:[%s2168_s24 + $0x2f8] sm:$0xff] }
  0x92   : > { %v1807_v55 = vpack.c.bf16 %v1066_v46, %v1065_v45  ;;  %v686_v56 = vunpack.c.h.bf16 %v338_v39  ;;  %v867_v57 = vadd.f32 %v557_v48, %v429_v43  ;;  %v431_v58 = vunpack.c.l.bf16 %v211_v44  ;;  %v342_v39 = vld [vmem:[%s2168_s24 + $0x4f8] sm:$0xff] }
  0x93   : > { %v1067_v60 = vmul.f32 0.33333334, %v864_v49  ;;  %v1068_v61 = vmul.f32 0.33333334, %v866_v50  ;;  %v869_v62 = vadd.f32 %v558_v51, %v430_v47  ;;  %v432_v63 = vunpack.c.h.bf16 %v211_v44  ;;  %v215_v44 = vld [vmem:[%s2168_s24 + $0x100] sm:$0xff] }
  0x94   : > { %1552 = vst [vmem:[%s2192_s20 + $0xc8] sm:$0xff] %v1807_v55  ;;  %v868_v0 = vadd.f32 %v867_v57, %v685_v52  ;;  %v559_v1 = vunpack.c.l.bf16 %v275_v53  ;;  %v560_v2 = vunpack.c.h.bf16 %v275_v53  ;;  %v687_v3 = vunpack.c.l.bf16 %v339_v54  ;;  %v279_v53 = vld [vmem:[%s2168_s24 + $0x300] sm:$0xff] }
  0x95   : > { %v1808_v6 = vpack.c.bf16 %v1068_v61, %v1067_v60  ;;  %v870_v7 = vadd.f32 %v869_v62, %v686_v56  ;;  %v688_v8 = vunpack.c.h.bf16 %v339_v54  ;;  %v433_v9 = vunpack.c.l.bf16 %v212_v59  ;;  %v343_v54 = vld [vmem:[%s2168_s24 + $0x500] sm:$0xff] }
  0x96   : > { %v1069_v11 = vmul.f32 0.33333334, %v868_v0  ;;  %v871_v12 = vadd.f32 %v559_v1, %v431_v58  ;;  %v873_v13 = vadd.f32 %v560_v2, %v432_v63  ;;  %v434_v14 = vunpack.c.h.bf16 %v212_v59  ;;  %v216_v59 = vld [vmem:[%s2168_s24 + $0x108] sm:$0xff] }
  0x97   : > { %1553 = vst [vmem:[%s2192_s20 + $0xd0] sm:$0xff] %v1808_v6  ;;  %v1070_v15 = vmul.f32 0.33333334, %v870_v7  ;;  %v561_v16 = vunpack.c.l.bf16 %v276_v4  ;;  %v562_v17 = vunpack.c.h.bf16 %v276_v4  ;;  %v689_v18 = vunpack.c.l.bf16 %v340_v5  ;;  %v280_v4 = vld [vmem:[%s2168_s24 + $0x308] sm:$0xff] }
  0x98   : > { %v872_v20 = vadd.f32 %v871_v12, %v687_v3  ;;  %v874_v21 = vadd.f32 %v873_v13, %v688_v8  ;;  %v690_v22 = vunpack.c.h.bf16 %v340_v5  ;;  %v435_v24 = vunpack.c.l.bf16 %v213_v10  ;;  %v344_v5 = vld [vmem:[%s2168_s24 + $0x508] sm:$0xff] }
  0x99   : > { %v1809_v25 = vpack.c.bf16 %v1070_v15, %v1069_v11  ;;  %v875_v26 = vadd.f32 %v561_v16, %v433_v9  ;;  %v877_v27 = vadd.f32 %v562_v17, %v434_v14  ;;  %v436_v28 = vunpack.c.h.bf16 %v213_v10  ;;  %v217_v10 = vld [vmem:[%s2168_s24 + $0x110] sm:$0xff] }
  0x9a   : > { %v1071_v30 = vmul.f32 0.33333334, %v872_v20  ;;  %v1072_v31 = vmul.f32 0.33333334, %v874_v21  ;;  %v563_v32 = vunpack.c.l.bf16 %v277_v19  ;;  %v564_v33 = vunpack.c.h.bf16 %v277_v19  ;;  %v281_v19 = vld [vmem:[%s2168_s24 + $0x310] sm:$0xff] }
  0x9b   : > { %1554 = vst [vmem:[%s2192_s20 + $0xd8] sm:$0xff] %v1809_v25  ;;  %v876_v35 = vadd.f32 %v875_v26, %v689_v18  ;;  %v878_v36 = vadd.f32 %v877_v27, %v690_v22  ;;  %v691_v37 = vunpack.c.l.bf16 %v341_v23  ;;  %v692_v38 = vunpack.c.h.bf16 %v341_v23  ;;  %v345_v23 = vld [vmem:[%s2168_s24 + $0x510] sm:$0xff] }
  0x9c   : > { %v1810_v40 = vpack.c.bf16 %v1072_v31, %v1071_v30  ;;  %v879_v41 = vadd.f32 %v563_v32, %v435_v24  ;;  %v881_v42 = vadd.f32 %v564_v33, %v436_v28  ;;  %v437_v43 = vunpack.c.l.bf16 %v214_v29 }
  0x9d   : > { %v1073_v45 = vmul.f32 0.33333334, %v876_v35  ;;  %v1074_v46 = vmul.f32 0.33333334, %v878_v36  ;;  %v438_v47 = vunpack.c.h.bf16 %v214_v29  ;;  %v565_v48 = vunpack.c.l.bf16 %v278_v34  ;;  %v218_v29 = vld [vmem:[%s2168_s24 + $0x118] sm:$0xff] }
  0x9e   : > { %1555 = vst [vmem:[%s2192_s20 + $0xe0] sm:$0xff] %v1810_v40  ;;  %v880_v49 = vadd.f32 %v879_v41, %v691_v37  ;;  %v882_v50 = vadd.f32 %v881_v42, %v692_v38  ;;  %v566_v51 = vunpack.c.h.bf16 %v278_v34  ;;  %v693_v52 = vunpack.c.l.bf16 %v342_v39  ;;  %v282_v34 = vld [vmem:[%s2168_s24 + $0x318] sm:$0xff] }
  0x9f   : > { %v1811_v55 = vpack.c.bf16 %v1074_v46, %v1073_v45  ;;  %v694_v56 = vunpack.c.h.bf16 %v342_v39  ;;  %v883_v57 = vadd.f32 %v565_v48, %v437_v43  ;;  %v439_v58 = vunpack.c.l.bf16 %v215_v44  ;;  %v346_v39 = vld [vmem:[%s2168_s24 + $0x518] sm:$0xff] }
  0xa0   : > { %v1075_v60 = vmul.f32 0.33333334, %v880_v49  ;;  %v1076_v61 = vmul.f32 0.33333334, %v882_v50  ;;  %v885_v62 = vadd.f32 %v566_v51, %v438_v47  ;;  %v440_v63 = vunpack.c.h.bf16 %v215_v44  ;;  %v219_v44 = vld [vmem:[%s2168_s24 + $0x120] sm:$0xff] }
  0xa1   : > { %1556 = vst [vmem:[%s2192_s20 + $0xe8] sm:$0xff] %v1811_v55  ;;  %v884_v0 = vadd.f32 %v883_v57, %v693_v52  ;;  %v567_v1 = vunpack.c.l.bf16 %v279_v53  ;;  %v568_v2 = vunpack.c.h.bf16 %v279_v53  ;;  %v695_v3 = vunpack.c.l.bf16 %v343_v54  ;;  %v283_v53 = vld [vmem:[%s2168_s24 + $0x320] sm:$0xff] }
  0xa2   : > { %v1812_v6 = vpack.c.bf16 %v1076_v61, %v1075_v60  ;;  %v886_v7 = vadd.f32 %v885_v62, %v694_v56  ;;  %v696_v8 = vunpack.c.h.bf16 %v343_v54  ;;  %v441_v9 = vunpack.c.l.bf16 %v216_v59  ;;  %v347_v54 = vld [vmem:[%s2168_s24 + $0x520] sm:$0xff] }
  0xa3   : > { %v1077_v11 = vmul.f32 0.33333334, %v884_v0  ;;  %v887_v12 = vadd.f32 %v567_v1, %v439_v58  ;;  %v889_v13 = vadd.f32 %v568_v2, %v440_v63  ;;  %v442_v14 = vunpack.c.h.bf16 %v216_v59  ;;  %v220_v59 = vld [vmem:[%s2168_s24 + $0x128] sm:$0xff] }
  0xa4   : > { %1557 = vst [vmem:[%s2192_s20 + $0xf0] sm:$0xff] %v1812_v6  ;;  %v1078_v15 = vmul.f32 0.33333334, %v886_v7  ;;  %v569_v16 = vunpack.c.l.bf16 %v280_v4  ;;  %v570_v17 = vunpack.c.h.bf16 %v280_v4  ;;  %v697_v18 = vunpack.c.l.bf16 %v344_v5  ;;  %v284_v4 = vld [vmem:[%s2168_s24 + $0x328] sm:$0xff] }
  0xa5   : > { %v888_v20 = vadd.f32 %v887_v12, %v695_v3  ;;  %v890_v21 = vadd.f32 %v889_v13, %v696_v8  ;;  %v698_v22 = vunpack.c.h.bf16 %v344_v5  ;;  %v443_v24 = vunpack.c.l.bf16 %v217_v10  ;;  %v348_v5 = vld [vmem:[%s2168_s24 + $0x528] sm:$0xff] }
  0xa6   : > { %v1813_v25 = vpack.c.bf16 %v1078_v15, %v1077_v11  ;;  %v891_v26 = vadd.f32 %v569_v16, %v441_v9  ;;  %v893_v27 = vadd.f32 %v570_v17, %v442_v14  ;;  %v444_v28 = vunpack.c.h.bf16 %v217_v10  ;;  %v221_v10 = vld [vmem:[%s2168_s24 + $0x130] sm:$0xff] }
  0xa7   : > { %v1079_v30 = vmul.f32 0.33333334, %v888_v20  ;;  %v1080_v31 = vmul.f32 0.33333334, %v890_v21  ;;  %v571_v32 = vunpack.c.l.bf16 %v281_v19  ;;  %v572_v33 = vunpack.c.h.bf16 %v281_v19  ;;  %v285_v19 = vld [vmem:[%s2168_s24 + $0x330] sm:$0xff] }
  0xa8   : > { %1558 = vst [vmem:[%s2192_s20 + $0xf8] sm:$0xff] %v1813_v25  ;;  %v892_v35 = vadd.f32 %v891_v26, %v697_v18  ;;  %v894_v36 = vadd.f32 %v893_v27, %v698_v22  ;;  %v699_v37 = vunpack.c.l.bf16 %v345_v23  ;;  %v700_v38 = vunpack.c.h.bf16 %v345_v23  ;;  %v349_v23 = vld [vmem:[%s2168_s24 + $0x530] sm:$0xff] }
  0xa9   : > { %v1814_v40 = vpack.c.bf16 %v1080_v31, %v1079_v30  ;;  %v895_v41 = vadd.f32 %v571_v32, %v443_v24  ;;  %v897_v42 = vadd.f32 %v572_v33, %v444_v28  ;;  %v445_v43 = vunpack.c.l.bf16 %v218_v29 }
  0xaa   : > { %v1081_v45 = vmul.f32 0.33333334, %v892_v35  ;;  %v1082_v46 = vmul.f32 0.33333334, %v894_v36  ;;  %v446_v47 = vunpack.c.h.bf16 %v218_v29  ;;  %v573_v48 = vunpack.c.l.bf16 %v282_v34  ;;  %v222_v29 = vld [vmem:[%s2168_s24 + $0x138] sm:$0xff] }
  0xab   : > { %1559 = vst [vmem:[%s2192_s20 + $0x100] sm:$0xff] %v1814_v40  ;;  %v896_v49 = vadd.f32 %v895_v41, %v699_v37  ;;  %v898_v50 = vadd.f32 %v897_v42, %v700_v38  ;;  %v574_v51 = vunpack.c.h.bf16 %v282_v34  ;;  %v701_v52 = vunpack.c.l.bf16 %v346_v39  ;;  %v286_v34 = vld [vmem:[%s2168_s24 + $0x338] sm:$0xff] }
  0xac   : > { %v1815_v55 = vpack.c.bf16 %v1082_v46, %v1081_v45  ;;  %v702_v56 = vunpack.c.h.bf16 %v346_v39  ;;  %v899_v57 = vadd.f32 %v573_v48, %v445_v43  ;;  %v447_v58 = vunpack.c.l.bf16 %v219_v44  ;;  %v350_v39 = vld [vmem:[%s2168_s24 + $0x538] sm:$0xff] }
  0xad   : > { %v1083_v60 = vmul.f32 0.33333334, %v896_v49  ;;  %v1084_v61 = vmul.f32 0.33333334, %v898_v50  ;;  %v901_v62 = vadd.f32 %v574_v51, %v446_v47  ;;  %v448_v63 = vunpack.c.h.bf16 %v219_v44  ;;  %v223_v44 = vld [vmem:[%s2168_s24 + $0x140] sm:$0xff] }
  0xae   : > { %1560 = vst [vmem:[%s2192_s20 + $0x108] sm:$0xff] %v1815_v55  ;;  %v900_v0 = vadd.f32 %v899_v57, %v701_v52  ;;  %v575_v1 = vunpack.c.l.bf16 %v283_v53  ;;  %v576_v2 = vunpack.c.h.bf16 %v283_v53  ;;  %v703_v3 = vunpack.c.l.bf16 %v347_v54  ;;  %v287_v53 = vld [vmem:[%s2168_s24 + $0x340] sm:$0xff] }
  0xaf   : > { %v1816_v6 = vpack.c.bf16 %v1084_v61, %v1083_v60  ;;  %v902_v7 = vadd.f32 %v901_v62, %v702_v56  ;;  %v704_v8 = vunpack.c.h.bf16 %v347_v54  ;;  %v449_v9 = vunpack.c.l.bf16 %v220_v59  ;;  %v351_v54 = vld [vmem:[%s2168_s24 + $0x540] sm:$0xff] }
  0xb0   : > { %v1085_v11 = vmul.f32 0.33333334, %v900_v0  ;;  %v903_v12 = vadd.f32 %v575_v1, %v447_v58  ;;  %v905_v13 = vadd.f32 %v576_v2, %v448_v63  ;;  %v450_v14 = vunpack.c.h.bf16 %v220_v59  ;;  %v224_v59 = vld [vmem:[%s2168_s24 + $0x148] sm:$0xff] }
  0xb1   : > { %1561 = vst [vmem:[%s2192_s20 + $0x110] sm:$0xff] %v1816_v6  ;;  %v1086_v15 = vmul.f32 0.33333334, %v902_v7  ;;  %v577_v16 = vunpack.c.l.bf16 %v284_v4  ;;  %v578_v17 = vunpack.c.h.bf16 %v284_v4  ;;  %v705_v18 = vunpack.c.l.bf16 %v348_v5  ;;  %v288_v4 = vld [vmem:[%s2168_s24 + $0x348] sm:$0xff] }
  0xb2   : > { %v904_v20 = vadd.f32 %v903_v12, %v703_v3  ;;  %v906_v21 = vadd.f32 %v905_v13, %v704_v8  ;;  %v706_v22 = vunpack.c.h.bf16 %v348_v5  ;;  %v451_v24 = vunpack.c.l.bf16 %v221_v10  ;;  %v352_v5 = vld [vmem:[%s2168_s24 + $0x548] sm:$0xff] }
  0xb3   : > { %v1817_v25 = vpack.c.bf16 %v1086_v15, %v1085_v11  ;;  %v907_v26 = vadd.f32 %v577_v16, %v449_v9  ;;  %v909_v27 = vadd.f32 %v578_v17, %v450_v14  ;;  %v452_v28 = vunpack.c.h.bf16 %v221_v10  ;;  %v225_v10 = vld [vmem:[%s2168_s24 + $0x150] sm:$0xff] }
  0xb4   : > { %v1087_v30 = vmul.f32 0.33333334, %v904_v20  ;;  %v1088_v31 = vmul.f32 0.33333334, %v906_v21  ;;  %v579_v32 = vunpack.c.l.bf16 %v285_v19  ;;  %v580_v33 = vunpack.c.h.bf16 %v285_v19  ;;  %v289_v19 = vld [vmem:[%s2168_s24 + $0x350] sm:$0xff] }
  0xb5   : > { %1562 = vst [vmem:[%s2192_s20 + $0x118] sm:$0xff] %v1817_v25  ;;  %v908_v35 = vadd.f32 %v907_v26, %v705_v18  ;;  %v910_v36 = vadd.f32 %v909_v27, %v706_v22  ;;  %v707_v37 = vunpack.c.l.bf16 %v349_v23  ;;  %v708_v38 = vunpack.c.h.bf16 %v349_v23  ;;  %v353_v23 = vld [vmem:[%s2168_s24 + $0x550] sm:$0xff] }
  0xb6   : > { %v1818_v40 = vpack.c.bf16 %v1088_v31, %v1087_v30  ;;  %v911_v41 = vadd.f32 %v579_v32, %v451_v24  ;;  %v913_v42 = vadd.f32 %v580_v33, %v452_v28  ;;  %v453_v43 = vunpack.c.l.bf16 %v222_v29 }
  0xb7   : > { %v1089_v45 = vmul.f32 0.33333334, %v908_v35  ;;  %v1090_v46 = vmul.f32 0.33333334, %v910_v36  ;;  %v454_v47 = vunpack.c.h.bf16 %v222_v29  ;;  %v581_v48 = vunpack.c.l.bf16 %v286_v34  ;;  %v226_v29 = vld [vmem:[%s2168_s24 + $0x158] sm:$0xff] }
  0xb8   : > { %1563 = vst [vmem:[%s2192_s20 + $0x120] sm:$0xff] %v1818_v40  ;;  %v912_v49 = vadd.f32 %v911_v41, %v707_v37  ;;  %v914_v50 = vadd.f32 %v913_v42, %v708_v38  ;;  %v582_v51 = vunpack.c.h.bf16 %v286_v34  ;;  %v709_v52 = vunpack.c.l.bf16 %v350_v39  ;;  %v290_v34 = vld [vmem:[%s2168_s24 + $0x358] sm:$0xff] }
  0xb9   : > { %v1819_v55 = vpack.c.bf16 %v1090_v46, %v1089_v45  ;;  %v710_v56 = vunpack.c.h.bf16 %v350_v39  ;;  %v915_v57 = vadd.f32 %v581_v48, %v453_v43  ;;  %v455_v58 = vunpack.c.l.bf16 %v223_v44  ;;  %v354_v39 = vld [vmem:[%s2168_s24 + $0x558] sm:$0xff] }
  0xba   : > { %v1091_v60 = vmul.f32 0.33333334, %v912_v49  ;;  %v1092_v61 = vmul.f32 0.33333334, %v914_v50  ;;  %v917_v62 = vadd.f32 %v582_v51, %v454_v47  ;;  %v456_v63 = vunpack.c.h.bf16 %v223_v44  ;;  %v227_v44 = vld [vmem:[%s2168_s24 + $0x160] sm:$0xff] }
  0xbb   : > { %1564 = vst [vmem:[%s2192_s20 + $0x128] sm:$0xff] %v1819_v55  ;;  %v916_v0 = vadd.f32 %v915_v57, %v709_v52  ;;  %v583_v1 = vunpack.c.l.bf16 %v287_v53  ;;  %v584_v2 = vunpack.c.h.bf16 %v287_v53  ;;  %v711_v3 = vunpack.c.l.bf16 %v351_v54  ;;  %v291_v53 = vld [vmem:[%s2168_s24 + $0x360] sm:$0xff] }
  0xbc   : > { %v1820_v6 = vpack.c.bf16 %v1092_v61, %v1091_v60  ;;  %v918_v7 = vadd.f32 %v917_v62, %v710_v56  ;;  %v712_v8 = vunpack.c.h.bf16 %v351_v54  ;;  %v457_v9 = vunpack.c.l.bf16 %v224_v59  ;;  %v355_v54 = vld [vmem:[%s2168_s24 + $0x560] sm:$0xff] }
  0xbd   : > { %v1093_v11 = vmul.f32 0.33333334, %v916_v0  ;;  %v919_v12 = vadd.f32 %v583_v1, %v455_v58  ;;  %v921_v13 = vadd.f32 %v584_v2, %v456_v63  ;;  %v458_v14 = vunpack.c.h.bf16 %v224_v59  ;;  %v228_v59 = vld [vmem:[%s2168_s24 + $0x168] sm:$0xff] }
  0xbe   : > { %1565 = vst [vmem:[%s2192_s20 + $0x130] sm:$0xff] %v1820_v6  ;;  %v1094_v15 = vmul.f32 0.33333334, %v918_v7  ;;  %v585_v16 = vunpack.c.l.bf16 %v288_v4  ;;  %v586_v17 = vunpack.c.h.bf16 %v288_v4  ;;  %v713_v18 = vunpack.c.l.bf16 %v352_v5  ;;  %v292_v4 = vld [vmem:[%s2168_s24 + $0x368] sm:$0xff] }
  0xbf   : > { %v920_v20 = vadd.f32 %v919_v12, %v711_v3  ;;  %v922_v21 = vadd.f32 %v921_v13, %v712_v8  ;;  %v714_v22 = vunpack.c.h.bf16 %v352_v5  ;;  %v459_v24 = vunpack.c.l.bf16 %v225_v10  ;;  %v356_v5 = vld [vmem:[%s2168_s24 + $0x568] sm:$0xff] }
  0xc0   : > { %v1821_v25 = vpack.c.bf16 %v1094_v15, %v1093_v11  ;;  %v923_v26 = vadd.f32 %v585_v16, %v457_v9  ;;  %v925_v27 = vadd.f32 %v586_v17, %v458_v14  ;;  %v460_v28 = vunpack.c.h.bf16 %v225_v10  ;;  %v229_v10 = vld [vmem:[%s2168_s24 + $0x170] sm:$0xff] }
  0xc1   : > { %v1095_v30 = vmul.f32 0.33333334, %v920_v20  ;;  %v1096_v31 = vmul.f32 0.33333334, %v922_v21  ;;  %v587_v32 = vunpack.c.l.bf16 %v289_v19  ;;  %v588_v33 = vunpack.c.h.bf16 %v289_v19  ;;  %v293_v19 = vld [vmem:[%s2168_s24 + $0x370] sm:$0xff] }
  0xc2   : > { %1566 = vst [vmem:[%s2192_s20 + $0x138] sm:$0xff] %v1821_v25  ;;  %v924_v35 = vadd.f32 %v923_v26, %v713_v18  ;;  %v926_v36 = vadd.f32 %v925_v27, %v714_v22  ;;  %v715_v37 = vunpack.c.l.bf16 %v353_v23  ;;  %v716_v38 = vunpack.c.h.bf16 %v353_v23  ;;  %v357_v23 = vld [vmem:[%s2168_s24 + $0x570] sm:$0xff] }
  0xc3   : > { %v1822_v40 = vpack.c.bf16 %v1096_v31, %v1095_v30  ;;  %v927_v41 = vadd.f32 %v587_v32, %v459_v24  ;;  %v929_v42 = vadd.f32 %v588_v33, %v460_v28  ;;  %v461_v43 = vunpack.c.l.bf16 %v226_v29 }
  0xc4   : > { %v1097_v45 = vmul.f32 0.33333334, %v924_v35  ;;  %v1098_v46 = vmul.f32 0.33333334, %v926_v36  ;;  %v462_v47 = vunpack.c.h.bf16 %v226_v29  ;;  %v589_v48 = vunpack.c.l.bf16 %v290_v34  ;;  %v230_v29 = vld [vmem:[%s2168_s24 + $0x178] sm:$0xff] }
  0xc5   : > { %1567 = vst [vmem:[%s2192_s20 + $0x140] sm:$0xff] %v1822_v40  ;;  %v928_v49 = vadd.f32 %v927_v41, %v715_v37  ;;  %v930_v50 = vadd.f32 %v929_v42, %v716_v38  ;;  %v590_v51 = vunpack.c.h.bf16 %v290_v34  ;;  %v717_v52 = vunpack.c.l.bf16 %v354_v39  ;;  %v294_v34 = vld [vmem:[%s2168_s24 + $0x378] sm:$0xff] }
  0xc6   : > { %v1823_v55 = vpack.c.bf16 %v1098_v46, %v1097_v45  ;;  %v718_v56 = vunpack.c.h.bf16 %v354_v39  ;;  %v931_v57 = vadd.f32 %v589_v48, %v461_v43  ;;  %v463_v58 = vunpack.c.l.bf16 %v227_v44  ;;  %v358_v39 = vld [vmem:[%s2168_s24 + $0x578] sm:$0xff] }
  0xc7   : > { %v1099_v60 = vmul.f32 0.33333334, %v928_v49  ;;  %v1100_v61 = vmul.f32 0.33333334, %v930_v50  ;;  %v933_v62 = vadd.f32 %v590_v51, %v462_v47  ;;  %v464_v63 = vunpack.c.h.bf16 %v227_v44  ;;  %v231_v44 = vld [vmem:[%s2168_s24 + $0x180] sm:$0xff] }
  0xc8   : > { %1568 = vst [vmem:[%s2192_s20 + $0x148] sm:$0xff] %v1823_v55  ;;  %v932_v0 = vadd.f32 %v931_v57, %v717_v52  ;;  %v591_v1 = vunpack.c.l.bf16 %v291_v53  ;;  %v592_v2 = vunpack.c.h.bf16 %v291_v53  ;;  %v719_v3 = vunpack.c.l.bf16 %v355_v54  ;;  %v295_v53 = vld [vmem:[%s2168_s24 + $0x380] sm:$0xff] }
  0xc9   : > { %v1824_v6 = vpack.c.bf16 %v1100_v61, %v1099_v60  ;;  %v934_v7 = vadd.f32 %v933_v62, %v718_v56  ;;  %v720_v8 = vunpack.c.h.bf16 %v355_v54  ;;  %v465_v9 = vunpack.c.l.bf16 %v228_v59  ;;  %v359_v54 = vld [vmem:[%s2168_s24 + $0x580] sm:$0xff] }
  0xca   : > { %v1101_v11 = vmul.f32 0.33333334, %v932_v0  ;;  %v935_v12 = vadd.f32 %v591_v1, %v463_v58  ;;  %v937_v13 = vadd.f32 %v592_v2, %v464_v63  ;;  %v466_v14 = vunpack.c.h.bf16 %v228_v59  ;;  %v232_v59 = vld [vmem:[%s2168_s24 + $0x188] sm:$0xff] }
  0xcb   : > { %1569 = vst [vmem:[%s2192_s20 + $0x150] sm:$0xff] %v1824_v6  ;;  %v1102_v15 = vmul.f32 0.33333334, %v934_v7  ;;  %v593_v16 = vunpack.c.l.bf16 %v292_v4  ;;  %v594_v17 = vunpack.c.h.bf16 %v292_v4  ;;  %v721_v18 = vunpack.c.l.bf16 %v356_v5  ;;  %v296_v4 = vld [vmem:[%s2168_s24 + $0x388] sm:$0xff] }
  0xcc   : > { %v936_v20 = vadd.f32 %v935_v12, %v719_v3  ;;  %v938_v21 = vadd.f32 %v937_v13, %v720_v8  ;;  %v722_v22 = vunpack.c.h.bf16 %v356_v5  ;;  %v467_v24 = vunpack.c.l.bf16 %v229_v10  ;;  %v360_v5 = vld [vmem:[%s2168_s24 + $0x588] sm:$0xff] }
  0xcd   : > { %v1825_v25 = vpack.c.bf16 %v1102_v15, %v1101_v11  ;;  %v939_v26 = vadd.f32 %v593_v16, %v465_v9  ;;  %v941_v27 = vadd.f32 %v594_v17, %v466_v14  ;;  %v468_v28 = vunpack.c.h.bf16 %v229_v10  ;;  %v233_v10 = vld [vmem:[%s2168_s24 + $0x190] sm:$0xff] }
  0xce   : > { %v1103_v30 = vmul.f32 0.33333334, %v936_v20  ;;  %v1104_v31 = vmul.f32 0.33333334, %v938_v21  ;;  %v595_v32 = vunpack.c.l.bf16 %v293_v19  ;;  %v596_v33 = vunpack.c.h.bf16 %v293_v19  ;;  %v297_v19 = vld [vmem:[%s2168_s24 + $0x390] sm:$0xff] }
  0xcf   : > { %1570 = vst [vmem:[%s2192_s20 + $0x158] sm:$0xff] %v1825_v25  ;;  %v940_v35 = vadd.f32 %v939_v26, %v721_v18  ;;  %v942_v36 = vadd.f32 %v941_v27, %v722_v22  ;;  %v723_v37 = vunpack.c.l.bf16 %v357_v23  ;;  %v724_v38 = vunpack.c.h.bf16 %v357_v23  ;;  %v361_v23 = vld [vmem:[%s2168_s24 + $0x590] sm:$0xff] }
  0xd0   : > { %v1826_v40 = vpack.c.bf16 %v1104_v31, %v1103_v30  ;;  %v943_v41 = vadd.f32 %v595_v32, %v467_v24  ;;  %v945_v42 = vadd.f32 %v596_v33, %v468_v28  ;;  %v469_v43 = vunpack.c.l.bf16 %v230_v29 }
  0xd1   : > { %v1105_v45 = vmul.f32 0.33333334, %v940_v35  ;;  %v1106_v46 = vmul.f32 0.33333334, %v942_v36  ;;  %v470_v47 = vunpack.c.h.bf16 %v230_v29  ;;  %v597_v48 = vunpack.c.l.bf16 %v294_v34  ;;  %v234_v29 = vld [vmem:[%s2168_s24 + $0x198] sm:$0xff] }
  0xd2   : > { %1571 = vst [vmem:[%s2192_s20 + $0x160] sm:$0xff] %v1826_v40  ;;  %v944_v49 = vadd.f32 %v943_v41, %v723_v37  ;;  %v946_v50 = vadd.f32 %v945_v42, %v724_v38  ;;  %v598_v51 = vunpack.c.h.bf16 %v294_v34  ;;  %v725_v52 = vunpack.c.l.bf16 %v358_v39  ;;  %v298_v34 = vld [vmem:[%s2168_s24 + $0x398] sm:$0xff] }
  0xd3   : > { %v1827_v55 = vpack.c.bf16 %v1106_v46, %v1105_v45  ;;  %v726_v56 = vunpack.c.h.bf16 %v358_v39  ;;  %v947_v57 = vadd.f32 %v597_v48, %v469_v43  ;;  %v471_v58 = vunpack.c.l.bf16 %v231_v44  ;;  %v362_v39 = vld [vmem:[%s2168_s24 + $0x598] sm:$0xff] }
  0xd4   : > { %v1107_v60 = vmul.f32 0.33333334, %v944_v49  ;;  %v1108_v61 = vmul.f32 0.33333334, %v946_v50  ;;  %v949_v62 = vadd.f32 %v598_v51, %v470_v47  ;;  %v472_v63 = vunpack.c.h.bf16 %v231_v44  ;;  %v235_v44 = vld [vmem:[%s2168_s24 + $0x1a0] sm:$0xff] }
  0xd5   : > { %1572 = vst [vmem:[%s2192_s20 + $0x168] sm:$0xff] %v1827_v55  ;;  %v948_v0 = vadd.f32 %v947_v57, %v725_v52  ;;  %v599_v1 = vunpack.c.l.bf16 %v295_v53  ;;  %v600_v2 = vunpack.c.h.bf16 %v295_v53  ;;  %v727_v3 = vunpack.c.l.bf16 %v359_v54  ;;  %v299_v53 = vld [vmem:[%s2168_s24 + $0x3a0] sm:$0xff] }
  0xd6   : > { %v1828_v6 = vpack.c.bf16 %v1108_v61, %v1107_v60  ;;  %v950_v7 = vadd.f32 %v949_v62, %v726_v56  ;;  %v728_v8 = vunpack.c.h.bf16 %v359_v54  ;;  %v473_v9 = vunpack.c.l.bf16 %v232_v59  ;;  %v363_v54 = vld [vmem:[%s2168_s24 + $0x5a0] sm:$0xff] }
  0xd7   : > { %v1109_v11 = vmul.f32 0.33333334, %v948_v0  ;;  %v951_v12 = vadd.f32 %v599_v1, %v471_v58  ;;  %v953_v13 = vadd.f32 %v600_v2, %v472_v63  ;;  %v474_v14 = vunpack.c.h.bf16 %v232_v59  ;;  %v236_v59 = vld [vmem:[%s2168_s24 + $0x1a8] sm:$0xff] }
  0xd8   : > { %1573 = vst [vmem:[%s2192_s20 + $0x170] sm:$0xff] %v1828_v6  ;;  %v1110_v15 = vmul.f32 0.33333334, %v950_v7  ;;  %v601_v16 = vunpack.c.l.bf16 %v296_v4  ;;  %v602_v17 = vunpack.c.h.bf16 %v296_v4  ;;  %v729_v18 = vunpack.c.l.bf16 %v360_v5  ;;  %v300_v4 = vld [vmem:[%s2168_s24 + $0x3a8] sm:$0xff] }
  0xd9   : > { %v952_v20 = vadd.f32 %v951_v12, %v727_v3  ;;  %v954_v21 = vadd.f32 %v953_v13, %v728_v8  ;;  %v730_v22 = vunpack.c.h.bf16 %v360_v5  ;;  %v475_v24 = vunpack.c.l.bf16 %v233_v10  ;;  %v364_v5 = vld [vmem:[%s2168_s24 + $0x5a8] sm:$0xff] }
  0xda   : > { %v1829_v25 = vpack.c.bf16 %v1110_v15, %v1109_v11  ;;  %v955_v26 = vadd.f32 %v601_v16, %v473_v9  ;;  %v957_v27 = vadd.f32 %v602_v17, %v474_v14  ;;  %v476_v28 = vunpack.c.h.bf16 %v233_v10  ;;  %v237_v10 = vld [vmem:[%s2168_s24 + $0x1b0] sm:$0xff] }
  0xdb   : > { %v1111_v30 = vmul.f32 0.33333334, %v952_v20  ;;  %v1112_v31 = vmul.f32 0.33333334, %v954_v21  ;;  %v603_v32 = vunpack.c.l.bf16 %v297_v19  ;;  %v604_v33 = vunpack.c.h.bf16 %v297_v19  ;;  %v301_v19 = vld [vmem:[%s2168_s24 + $0x3b0] sm:$0xff] }
  0xdc   : > { %1574 = vst [vmem:[%s2192_s20 + $0x178] sm:$0xff] %v1829_v25  ;;  %v956_v35 = vadd.f32 %v955_v26, %v729_v18  ;;  %v958_v36 = vadd.f32 %v957_v27, %v730_v22  ;;  %v731_v37 = vunpack.c.l.bf16 %v361_v23  ;;  %v732_v38 = vunpack.c.h.bf16 %v361_v23  ;;  %v365_v23 = vld [vmem:[%s2168_s24 + $0x5b0] sm:$0xff] }
  0xdd   : > { %v1830_v40 = vpack.c.bf16 %v1112_v31, %v1111_v30  ;;  %v959_v41 = vadd.f32 %v603_v32, %v475_v24  ;;  %v961_v42 = vadd.f32 %v604_v33, %v476_v28  ;;  %v477_v43 = vunpack.c.l.bf16 %v234_v29 }
  0xde   : > { %v1113_v45 = vmul.f32 0.33333334, %v956_v35  ;;  %v1114_v46 = vmul.f32 0.33333334, %v958_v36  ;;  %v478_v47 = vunpack.c.h.bf16 %v234_v29  ;;  %v605_v48 = vunpack.c.l.bf16 %v298_v34  ;;  %v238_v29 = vld [vmem:[%s2168_s24 + $0x1b8] sm:$0xff] }
  0xdf   : > { %1575 = vst [vmem:[%s2192_s20 + $0x180] sm:$0xff] %v1830_v40  ;;  %v960_v49 = vadd.f32 %v959_v41, %v731_v37  ;;  %v962_v50 = vadd.f32 %v961_v42, %v732_v38  ;;  %v606_v51 = vunpack.c.h.bf16 %v298_v34  ;;  %v733_v52 = vunpack.c.l.bf16 %v362_v39  ;;  %v302_v34 = vld [vmem:[%s2168_s24 + $0x3b8] sm:$0xff] }
  0xe0   : > { %v1831_v55 = vpack.c.bf16 %v1114_v46, %v1113_v45  ;;  %v734_v56 = vunpack.c.h.bf16 %v362_v39  ;;  %v963_v57 = vadd.f32 %v605_v48, %v477_v43  ;;  %v479_v58 = vunpack.c.l.bf16 %v235_v44  ;;  %v366_v39 = vld [vmem:[%s2168_s24 + $0x5b8] sm:$0xff] }
  0xe1   : > { %v1115_v60 = vmul.f32 0.33333334, %v960_v49  ;;  %v1116_v61 = vmul.f32 0.33333334, %v962_v50  ;;  %v965_v62 = vadd.f32 %v606_v51, %v478_v47  ;;  %v480_v63 = vunpack.c.h.bf16 %v235_v44  ;;  %v239_v44 = vld [vmem:[%s2168_s24 + $0x1c0] sm:$0xff] }
  0xe2   : > { %1576 = vst [vmem:[%s2192_s20 + $0x188] sm:$0xff] %v1831_v55  ;;  %v964_v0 = vadd.f32 %v963_v57, %v733_v52  ;;  %v607_v1 = vunpack.c.l.bf16 %v299_v53  ;;  %v608_v2 = vunpack.c.h.bf16 %v299_v53  ;;  %v735_v3 = vunpack.c.l.bf16 %v363_v54  ;;  %v303_v53 = vld [vmem:[%s2168_s24 + $0x3c0] sm:$0xff] }
  0xe3   : > { %v1832_v6 = vpack.c.bf16 %v1116_v61, %v1115_v60  ;;  %v966_v7 = vadd.f32 %v965_v62, %v734_v56  ;;  %v736_v8 = vunpack.c.h.bf16 %v363_v54  ;;  %v481_v9 = vunpack.c.l.bf16 %v236_v59  ;;  %v367_v54 = vld [vmem:[%s2168_s24 + $0x5c0] sm:$0xff] }
  0xe4   : > { %v1117_v11 = vmul.f32 0.33333334, %v964_v0  ;;  %v967_v12 = vadd.f32 %v607_v1, %v479_v58  ;;  %v969_v13 = vadd.f32 %v608_v2, %v480_v63  ;;  %v482_v14 = vunpack.c.h.bf16 %v236_v59  ;;  %v240_v59 = vld [vmem:[%s2168_s24 + $0x1c8] sm:$0xff] }
  0xe5   : > { %1577 = vst [vmem:[%s2192_s20 + $0x190] sm:$0xff] %v1832_v6  ;;  %v1118_v15 = vmul.f32 0.33333334, %v966_v7  ;;  %v609_v16 = vunpack.c.l.bf16 %v300_v4  ;;  %v610_v17 = vunpack.c.h.bf16 %v300_v4  ;;  %v737_v18 = vunpack.c.l.bf16 %v364_v5  ;;  %v304_v4 = vld [vmem:[%s2168_s24 + $0x3c8] sm:$0xff] }
  0xe6   : > { %v968_v20 = vadd.f32 %v967_v12, %v735_v3  ;;  %v970_v21 = vadd.f32 %v969_v13, %v736_v8  ;;  %v738_v22 = vunpack.c.h.bf16 %v364_v5  ;;  %v483_v24 = vunpack.c.l.bf16 %v237_v10  ;;  %v368_v5 = vld [vmem:[%s2168_s24 + $0x5c8] sm:$0xff] }
  0xe7   : > { %v1833_v25 = vpack.c.bf16 %v1118_v15, %v1117_v11  ;;  %v971_v26 = vadd.f32 %v609_v16, %v481_v9  ;;  %v973_v27 = vadd.f32 %v610_v17, %v482_v14  ;;  %v484_v28 = vunpack.c.h.bf16 %v237_v10  ;;  %v241_v10 = vld [vmem:[%s2168_s24 + $0x1d0] sm:$0xff] }
  0xe8   : > { %v1119_v30 = vmul.f32 0.33333334, %v968_v20  ;;  %v1120_v31 = vmul.f32 0.33333334, %v970_v21  ;;  %v611_v32 = vunpack.c.l.bf16 %v301_v19  ;;  %v612_v33 = vunpack.c.h.bf16 %v301_v19  ;;  %v305_v19 = vld [vmem:[%s2168_s24 + $0x3d0] sm:$0xff] }
  0xe9   : > { %1578 = vst [vmem:[%s2192_s20 + $0x198] sm:$0xff] %v1833_v25  ;;  %v972_v35 = vadd.f32 %v971_v26, %v737_v18  ;;  %v974_v36 = vadd.f32 %v973_v27, %v738_v22  ;;  %v739_v37 = vunpack.c.l.bf16 %v365_v23  ;;  %v740_v38 = vunpack.c.h.bf16 %v365_v23  ;;  %v369_v23 = vld [vmem:[%s2168_s24 + $0x5d0] sm:$0xff] }
  0xea   : > { %v1834_v40 = vpack.c.bf16 %v1120_v31, %v1119_v30  ;;  %v975_v41 = vadd.f32 %v611_v32, %v483_v24  ;;  %v977_v42 = vadd.f32 %v612_v33, %v484_v28  ;;  %v485_v43 = vunpack.c.l.bf16 %v238_v29 }
  0xeb   : > { %v1121_v45 = vmul.f32 0.33333334, %v972_v35  ;;  %v1122_v46 = vmul.f32 0.33333334, %v974_v36  ;;  %v486_v47 = vunpack.c.h.bf16 %v238_v29  ;;  %v613_v48 = vunpack.c.l.bf16 %v302_v34  ;;  %v242_v29 = vld [vmem:[%s2168_s24 + $0x1d8] sm:$0xff] }
  0xec   : > { %1579 = vst [vmem:[%s2192_s20 + $0x1a0] sm:$0xff] %v1834_v40  ;;  %v976_v49 = vadd.f32 %v975_v41, %v739_v37  ;;  %v978_v50 = vadd.f32 %v977_v42, %v740_v38  ;;  %v614_v51 = vunpack.c.h.bf16 %v302_v34  ;;  %v741_v52 = vunpack.c.l.bf16 %v366_v39  ;;  %v306_v34 = vld [vmem:[%s2168_s24 + $0x3d8] sm:$0xff] }
  0xed   : > { %v1835_v55 = vpack.c.bf16 %v1122_v46, %v1121_v45  ;;  %v742_v56 = vunpack.c.h.bf16 %v366_v39  ;;  %v979_v57 = vadd.f32 %v613_v48, %v485_v43  ;;  %v487_v58 = vunpack.c.l.bf16 %v239_v44  ;;  %v370_v39 = vld [vmem:[%s2168_s24 + $0x5d8] sm:$0xff] }
  0xee   : > { %v1123_v60 = vmul.f32 0.33333334, %v976_v49  ;;  %v1124_v61 = vmul.f32 0.33333334, %v978_v50  ;;  %v981_v62 = vadd.f32 %v614_v51, %v486_v47  ;;  %v488_v63 = vunpack.c.h.bf16 %v239_v44  ;;  %v243_v44 = vld [vmem:[%s2168_s24 + $0x1e0] sm:$0xff] }
  0xef   : > { %1580 = vst [vmem:[%s2192_s20 + $0x1a8] sm:$0xff] %v1835_v55  ;;  %v980_v0 = vadd.f32 %v979_v57, %v741_v52  ;;  %v615_v1 = vunpack.c.l.bf16 %v303_v53  ;;  %v616_v2 = vunpack.c.h.bf16 %v303_v53  ;;  %v743_v3 = vunpack.c.l.bf16 %v367_v54  ;;  %v307_v53 = vld [vmem:[%s2168_s24 + $0x3e0] sm:$0xff] }
  0xf0   : > { %v1836_v6 = vpack.c.bf16 %v1124_v61, %v1123_v60  ;;  %v982_v7 = vadd.f32 %v981_v62, %v742_v56  ;;  %v744_v8 = vunpack.c.h.bf16 %v367_v54  ;;  %v489_v9 = vunpack.c.l.bf16 %v240_v59  ;;  %v371_v54 = vld [vmem:[%s2168_s24 + $0x5e0] sm:$0xff] }
  0xf1   : > { %v1125_v11 = vmul.f32 0.33333334, %v980_v0  ;;  %v983_v12 = vadd.f32 %v615_v1, %v487_v58  ;;  %v985_v13 = vadd.f32 %v616_v2, %v488_v63  ;;  %v490_v14 = vunpack.c.h.bf16 %v240_v59  ;;  %v244_v59 = vld [vmem:[%s2168_s24 + $0x1e8] sm:$0xff] }
  0xf2   : > { %1581 = vst [vmem:[%s2192_s20 + $0x1b0] sm:$0xff] %v1836_v6  ;;  %v1126_v15 = vmul.f32 0.33333334, %v982_v7  ;;  %v617_v16 = vunpack.c.l.bf16 %v304_v4  ;;  %v618_v17 = vunpack.c.h.bf16 %v304_v4  ;;  %v745_v18 = vunpack.c.l.bf16 %v368_v5  ;;  %v308_v4 = vld [vmem:[%s2168_s24 + $0x3e8] sm:$0xff] }
  0xf3   : > { %v984_v20 = vadd.f32 %v983_v12, %v743_v3  ;;  %v986_v21 = vadd.f32 %v985_v13, %v744_v8  ;;  %v746_v22 = vunpack.c.h.bf16 %v368_v5  ;;  %v491_v24 = vunpack.c.l.bf16 %v241_v10  ;;  %v372_v5 = vld [vmem:[%s2168_s24 + $0x5e8] sm:$0xff] }
  0xf4   : > { %v1837_v25 = vpack.c.bf16 %v1126_v15, %v1125_v11  ;;  %v987_v26 = vadd.f32 %v617_v16, %v489_v9  ;;  %v989_v27 = vadd.f32 %v618_v17, %v490_v14  ;;  %v492_v28 = vunpack.c.h.bf16 %v241_v10  ;;  %v245_v10 = vld [vmem:[%s2168_s24 + $0x1f0] sm:$0xff] }
  0xf5   : > { %v1127_v30 = vmul.f32 0.33333334, %v984_v20  ;;  %v1128_v31 = vmul.f32 0.33333334, %v986_v21  ;;  %v619_v32 = vunpack.c.l.bf16 %v305_v19  ;;  %v620_v33 = vunpack.c.h.bf16 %v305_v19  ;;  %v309_v19 = vld [vmem:[%s2168_s24 + $0x3f0] sm:$0xff] }
  0xf6   : > { %1582 = vst [vmem:[%s2192_s20 + $0x1b8] sm:$0xff] %v1837_v25  ;;  %v988_v35 = vadd.f32 %v987_v26, %v745_v18  ;;  %v990_v36 = vadd.f32 %v989_v27, %v746_v22  ;;  %v747_v37 = vunpack.c.l.bf16 %v369_v23  ;;  %v748_v38 = vunpack.c.h.bf16 %v369_v23  ;;  %v373_v23 = vld [vmem:[%s2168_s24 + $0x5f0] sm:$0xff] }
  0xf7   : > { %v1838_v40 = vpack.c.bf16 %v1128_v31, %v1127_v30  ;;  %v991_v41 = vadd.f32 %v619_v32, %v491_v24  ;;  %v993_v42 = vadd.f32 %v620_v33, %v492_v28  ;;  %v493_v43 = vunpack.c.l.bf16 %v242_v29 }
  0xf8   : > { %v1129_v45 = vmul.f32 0.33333334, %v988_v35  ;;  %v1130_v46 = vmul.f32 0.33333334, %v990_v36  ;;  %v494_v47 = vunpack.c.h.bf16 %v242_v29  ;;  %v621_v48 = vunpack.c.l.bf16 %v306_v34  ;;  %v246_v29 = vld [vmem:[%s2168_s24 + $0x1f8] sm:$0xff] }
  0xf9   : > { %1583 = vst [vmem:[%s2192_s20 + $0x1c0] sm:$0xff] %v1838_v40  ;;  %v992_v49 = vadd.f32 %v991_v41, %v747_v37  ;;  %v994_v50 = vadd.f32 %v993_v42, %v748_v38  ;;  %v622_v51 = vunpack.c.h.bf16 %v306_v34  ;;  %v749_v52 = vunpack.c.l.bf16 %v370_v39  ;;  %v310_v34 = vld [vmem:[%s2168_s24 + $0x3f8] sm:$0xff] }
  0xfa   : > { %v1839_v55 = vpack.c.bf16 %v1130_v46, %v1129_v45  ;;  %v750_v56 = vunpack.c.h.bf16 %v370_v39  ;;  %v995_v57 = vadd.f32 %v621_v48, %v493_v43  ;;  %v495_v58 = vunpack.c.l.bf16 %v243_v44  ;;  %v374_v39 = vld [vmem:[%s2168_s24 + $0x5f8] sm:$0xff] }
  0xfb   : > { %v1131_v60 = vmul.f32 0.33333334, %v992_v49  ;;  %v1132_v61 = vmul.f32 0.33333334, %v994_v50  ;;  %v997_v62 = vadd.f32 %v622_v51, %v494_v47  ;;  %v496_v63 = vunpack.c.h.bf16 %v243_v44 }
  0xfc   : > { %1584 = vst [vmem:[%s2192_s20 + $0x1c8] sm:$0xff] %v1839_v55  ;;  %v996_v0 = vadd.f32 %v995_v57, %v749_v52  ;;  %v623_v1 = vunpack.c.l.bf16 %v307_v53  ;;  %v624_v2 = vunpack.c.h.bf16 %v307_v53  ;;  %v751_v3 = vunpack.c.l.bf16 %v371_v54 }
  0xfd   : > { %v1840_v6 = vpack.c.bf16 %v1132_v61, %v1131_v60  ;;  %v998_v7 = vadd.f32 %v997_v62, %v750_v56  ;;  %v752_v8 = vunpack.c.h.bf16 %v371_v54  ;;  %v497_v9 = vunpack.c.l.bf16 %v244_v59 }
  0xfe   : > { %v1133_v11 = vmul.f32 0.33333334, %v996_v0  ;;  %v999_v12 = vadd.f32 %v623_v1, %v495_v58  ;;  %v1001_v13 = vadd.f32 %v624_v2, %v496_v63  ;;  %v498_v14 = vunpack.c.h.bf16 %v244_v59 }
  0xff   : > { %1585 = vst [vmem:[%s2192_s20 + $0x1d0] sm:$0xff] %v1840_v6  ;;  %v1134_v15 = vmul.f32 0.33333334, %v998_v7  ;;  %v625_v16 = vunpack.c.l.bf16 %v308_v4  ;;  %v626_v17 = vunpack.c.h.bf16 %v308_v4  ;;  %v753_v18 = vunpack.c.l.bf16 %v372_v5 }
 0x100   : > { %v1000_v20 = vadd.f32 %v999_v12, %v751_v3  ;;  %v1002_v21 = vadd.f32 %v1001_v13, %v752_v8  ;;  %v754_v22 = vunpack.c.h.bf16 %v372_v5  ;;  %v499_v24 = vunpack.c.l.bf16 %v245_v10 }
 0x101   : > { %v1841_v25 = vpack.c.bf16 %v1134_v15, %v1133_v11  ;;  %v1003_v26 = vadd.f32 %v625_v16, %v497_v9  ;;  %v1005_v27 = vadd.f32 %v626_v17, %v498_v14  ;;  %v500_v28 = vunpack.c.h.bf16 %v245_v10 }
 0x102   : > { %v1135_v30 = vmul.f32 0.33333334, %v1000_v20  ;;  %v1136_v31 = vmul.f32 0.33333334, %v1002_v21  ;;  %v627_v32 = vunpack.c.l.bf16 %v309_v19  ;;  %v628_v33 = vunpack.c.h.bf16 %v309_v19 }
 0x103   : > { %1586 = vst [vmem:[%s2192_s20 + $0x1d8] sm:$0xff] %v1841_v25  ;;  %v1004_v35 = vadd.f32 %v1003_v26, %v753_v18  ;;  %v1006_v36 = vadd.f32 %v1005_v27, %v754_v22  ;;  %v755_v37 = vunpack.c.l.bf16 %v373_v23  ;;  %v756_v38 = vunpack.c.h.bf16 %v373_v23 }
 0x104   : > { %v1842_v40 = vpack.c.bf16 %v1136_v31, %v1135_v30  ;;  %v1007_v41 = vadd.f32 %v627_v32, %v499_v24  ;;  %v1009_v42 = vadd.f32 %v628_v33, %v500_v28  ;;  %v501_v43 = vunpack.c.l.bf16 %v246_v29 }
 0x105   : > { %v1137_v44 = vmul.f32 0.33333334, %v1004_v35  ;;  %v1138_v45 = vmul.f32 0.33333334, %v1006_v36  ;;  %v502_v46 = vunpack.c.h.bf16 %v246_v29  ;;  %v629_v47 = vunpack.c.l.bf16 %v310_v34 }
 0x106   : > { %1587 = vst [vmem:[%s2192_s20 + $0x1e0] sm:$0xff] %v1842_v40  ;;  %v1008_v48 = vadd.f32 %v1007_v41, %v755_v37  ;;  %v1010_v49 = vadd.f32 %v1009_v42, %v756_v38  ;;  %v630_v50 = vunpack.c.h.bf16 %v310_v34  ;;  %v757_v51 = vunpack.c.l.bf16 %v374_v39 }
 0x107   : > { %v1843_v52 = vpack.c.bf16 %v1138_v45, %v1137_v44  ;;  %v758_v53 = vunpack.c.h.bf16 %v374_v39  ;;  %v1011_v54 = vadd.f32 %v629_v47, %v501_v43 }
 0x108   : > { %v1139_v55 = vmul.f32 0.33333334, %v1008_v48  ;;  %v1140_v56 = vmul.f32 0.33333334, %v1010_v49  ;;  %v1013_v57 = vadd.f32 %v630_v50, %v502_v46 }
 0x109   : > { %1588 = vst [vmem:[%s2192_s20 + $0x1e8] sm:$0xff] %v1843_v52  ;;  %v1012_v58 = vadd.f32 %v1011_v54, %v757_v51 }
 0x10a   : > { %v1844_v59 = vpack.c.bf16 %v1140_v56, %v1139_v55  ;;  %v1014_v60 = vadd.f32 %v1013_v57, %v758_v53 }
 0x10b   : > { %v1141_v61 = vmul.f32 0.33333334, %v1012_v58 }
 0x10c   : > { %1589 = vst [vmem:[%s2192_s20 + $0x1f0] sm:$0xff] %v1844_v59  ;;  %v1142_v62 = vmul.f32 0.33333334, %v1014_v60 }
 0x10e   : > { %v1845_v63 = vpack.c.bf16 %v1142_v62, %v1141_v61 }
 0x110   : > { %1590 = vst [vmem:[%s2192_s20 + $0x1f8] sm:$0xff] %v1845_v63 }
 0x111   : > { %1952 = shalt.err (!%p1949_p10)
}
 0x112   : > { %s1953_s22 = scalar_lea.hbm %s2440_s29, 8192  ;;  %s1957_s19 = scalar_lea.hbm %s2498_s1, 32768 }
 0x113   : > { %p1954_p11 = scmp.ne.s32.totalorder %s2440_s29, %s1953_s22  ;;  %p1958_p1 = scmp.lt.u32.totalorder %s2440_s29, %s2498_s1 }
 0x114   : > { %p1959_p2 = scmp.lt.u32.totalorder %s1957_s19, %s1953_s22  ;;  %p1961_p4 = scmp.lt.u32.totalorder %s1953_s22, %s2440_s29 }
 0x115   : > { %p1955_p13 = pnand %p1954_p11, %p2124_p9 }
 0x116   : > { %p1960_p3 = por %p1959_p2, %p1958_p1 }
 0x117   : > { %p1956_p0 = pneg %p1955_p13 }
 0x118   : > { %p1962_p5 = por %p1961_p4, %p1960_p3 }
 0x11a   : > { %p1963_p6 = pnand %p1962_p5, %p1956_p0 }
 0x11c   : > { %1966 = shalt.err (!%p1963_p6)
}
 0x11d   : > { %s2047_s14 = smov 128   ;;  %s2048_s18 = smov 256  }
 0x11e   : > { %s2049_s9 = smov 8  }
 0x11f   : > { %1858 = dma.vmem_to_hbm [thread:$0]  (%p2124_p9), %s2442_s10, 8192, %s2440_s29, %s1592_s2, %s2047_s14, %s2048_s18, %s2049_s9  }
 0x120 PF: > { %p1864_p7 = scmp.ge.s32.totalorder %s2037_s13, 2  ;;  %s1623_s28 = sand.u32 1, %s2009_s6  }
 0x121   : > { %s1624_s30 = scalar_lea.sflag [#allocation4], %s1623_s28 }
 0x122   : > { %p1861_p8 = pnand %p1864_p7, %p2131_p12 }
 0x124   : > { %2004 = dma.done.wait (!%p1861_p8), %s1624_s30, 8192  }
 0x125   : > { %2006 = vsyncadd (!%p1861_p8), %s1624_s30, 4294959104  ;;  %s17_s13 = sadd.s32 1, %s2037_s13   ;;  %s2505_s21 = sld [smem:[#allocation11_spill]] }
 0x126   : > { %p14_p10 = scmp.ge.s32.totalorder %s17_s13, 6   ;;  %s2506_s6 = smov %s2013_s7 }
 0x127   : > { %s2507_s7 = smov %s2017_s8  ;;  %s2508_s8 = smov %s2136_s26 }
 0x128   : > { %s2509_s9 = smov %s2029_s11  ;;  %s2510_s10 = smov %s2033_s12 }
 0x129   : > { %s2511_s11 = smov %s2514_s16  ;;  %16 = sbr.rel (!%p14_p10) target bundleno = 7 (0x7), region = 74 }
 0x12b   : > { %s2512_s12 = smov %s2505_s21 }
 0x130   :  { %1629 = vsyncpa [#allocation3], 1 }
 0x131   :  { %1631 = vsyncpa [#allocation3 + $0x1], 1 }
 0x132   :  { %1632 = vsyncpa [#allocation4], 1 }
 0x133   :  { %1634 = vsyncpa [#allocation4 + $0x1], 1 }

</bundles_post_ra>
